<compile_context>
chip_gen: v6e
topology: v6e:2x2x1
jax: 0.10.0
libtpu: 0.0.40
codegen_flags: <defaults>
</compile_context>

<pallas_src>
import jax
import jax.numpy as jnp
import numpy as np
from jax.experimental import pallas as pl
from jax.experimental.pallas import tpu as pltpu


def _round_up(x, m):
    return (x + m - 1) // m * m


# ---------------------------------------------------------------------------
# Device-generation-aware tiling defaults.
# ---------------------------------------------------------------------------
def _device_kind():
    try:
        return jax.devices()[0].device_kind.lower()
    except Exception:  # pragma: no cover - CPU/interpret fallback
        return ""


_KIND = _device_kind()
_IS_V5E = ("v5 lite" in _KIND) or ("v5e" in _KIND) or ("v5litepod" in _KIND)
_MULTI_TC = any(t in _KIND for t in ("v7", "v4"))      # 2 TensorCores per device
_DEFAULT_BLOCK_M = 128 if _IS_V5E else 512             # fill 128-wide vs 256-wide MXU


# ---------------------------------------------------------------------------
# Fused MLP kernel: one grid step computes a (tm, N_pad) slab of logits.
# ---------------------------------------------------------------------------
def _mlp_fused_kernel(x_ref, w1_ref, b1_ref, w2_ref, b2_ref, w3_ref, b3_ref, o_ref):
    # x arrives as f32; cast to bf16 on the VPU (free slot under the MXU).
    x = x_ref[...].astype(jnp.bfloat16)
    # y1 = fc1(x); y2 = dropout(relu(y1)) -> dropout is identity (eval mode)
    h = jnp.dot(x, w1_ref[...], preferred_element_type=jnp.float32)
    h = jnp.maximum(h + b1_ref[...], 0.0)
    # y3 = fc2(y2); y4 = dropout(relu(y3))
    h = jnp.dot(h.astype(jnp.bfloat16), w2_ref[...], preferred_element_type=jnp.float32)
    h = jnp.maximum(h + b2_ref[...], 0.0)
    # y5 = fc3(y4): raw logits, no activation on the last layer
    y = jnp.dot(h.astype(jnp.bfloat16), w3_ref[...], preferred_element_type=jnp.float32)
    o_ref[...] = (y + b3_ref[...]).astype(o_ref.dtype)


# ---------------------------------------------------------------------------
# One-time parameter packing (outside the forward): transpose PyTorch (out,in)
# weights to (in,out), cast to bf16, pad K / final N to lane-dense multiples of
# 128, reshape biases to f32 row vectors.
# ---------------------------------------------------------------------------
def prepare_params(params):
    def pack_w(w):
        return jnp.asarray(w).T.astype(jnp.bfloat16)   # (out,in) -> (in,out)

    def pack_b(b):
        return jnp.asarray(b).reshape(1, -1).astype(jnp.float32)

    w1, w2, w3 = pack_w(params["fc1_w"]), pack_w(params["fc2_w"]), pack_w(params["fc3_w"])
    b1, b2, b3 = pack_b(params["fc1_b"]), pack_b(params["fc2_b"]), pack_b(params["fc3_b"])

    d_in, n_out = w1.shape[0], w3.shape[1]
    k_pad = _round_up(d_in, 128)
    n_pad = _round_up(max(n_out, 1), 128)
    if k_pad != d_in:
        w1 = jnp.pad(w1, ((0, k_pad - d_in), (0, 0)))
    if n_pad != n_out:
        w3 = jnp.pad(w3, ((0, 0), (0, n_pad - n_out)))
        b3 = jnp.pad(b3, ((0, 0), (0, n_pad - n_out)))

    return {"w1": w1, "b1": b1, "w2": w2, "b2": b2, "w3": w3, "b3": b3,
            "d_in": d_in, "k_pad": k_pad, "n_out": n_out, "n_pad": n_pad}


# ---------------------------------------------------------------------------
# Forward: pad batch / feature dims (f32), launch the fused kernel, slice pad off.
# ---------------------------------------------------------------------------
def mlp_forward(packed, x, *, block_m=None, out_dtype=jnp.float32):
    if block_m is None:
        block_m = _DEFAULT_BLOCK_M
    B, d_in = x.shape
    assert d_in == packed["d_in"]
    w1, w2, w3 = packed["w1"], packed["w2"], packed["w3"]
    b1, b2, b3 = packed["b1"], packed["b2"], packed["b3"]
    k_pad, n_pad, n_out = packed["k_pad"], packed["n_pad"], packed["n_out"]
    h1 = w1.shape[1]   # 512
    h2 = w2.shape[1]   # 256

    x = x.astype(jnp.float32)
    if k_pad != d_in:                                   # zero K-pad contributes nothing
        x = jnp.pad(x, ((0, 0), (0, k_pad - d_in)))

    # bf16 sublane tile is (16,128) -> round M padding and tile to multiples of 16.
    m16 = _round_up(max(B, 1), 16)
    tm = min(_round_up(block_m, 16), m16)
    # On 2-TensorCore chips make sure the "parallel" M axis has >= 2 grid steps
    # whenever the batch allows it, so the second core is not idle.
    if _MULTI_TC and (m16 // tm) < 2 and m16 >= 32:
        tm = _round_up((m16 + 1) // 2, 16)
    m_pad = _round_up(m16, tm)
    if m_pad != B:
        x = jnp.pad(x, ((0, m_pad - B), (0, 0)))

    grid = (m_pad // tm,)

    flops = 2 * m_pad * (k_pad * h1 + h1 * h2 + h2 * n_pad)
    bytes_accessed = (
        m_pad * k_pad * 4                                    # x (f32)
        + (k_pad * h1 + h1 * h2 + h2 * n_pad) * 2            # bf16 weights
        + (h1 + h2 + n_pad) * 4                              # f32 biases
        + m_pad * n_pad * jnp.dtype(out_dtype).itemsize      # logits
    )

    out = pl.pallas_call(
        _mlp_fused_kernel,
        out_shape=jax.ShapeDtypeStruct((m_pad, n_pad), out_dtype),
        grid_spec=pltpu.PrefetchScalarGridSpec(
            num_scalar_prefetch=0,
            grid=grid,
            in_specs=[
                pl.BlockSpec((tm, k_pad), lambda i: (i, 0)),   # x tile (f32, cast in-kernel)
                pl.BlockSpec((k_pad, h1), lambda i: (0, 0)),   # w1 (resident)
                pl.BlockSpec((1, h1), lambda i: (0, 0)),       # b1
                pl.BlockSpec((h1, h2), lambda i: (0, 0)),      # w2
                pl.BlockSpec((1, h2), lambda i: (0, 0)),       # b2
                pl.BlockSpec((h2, n_pad), lambda i: (0, 0)),   # w3 (padded N)
                pl.BlockSpec((1, n_pad), lambda i: (0, 0)),    # b3
            ],
            out_specs=pl.BlockSpec((tm, n_pad), lambda i: (i, 0)),
        ),
        compiler_params=pltpu.CompilerParams(
            dimension_semantics=("parallel",),           # batch tiles -> megacore sharding
            vmem_limit_bytes=32 * 1024 * 1024,           # plenty; stay below v7x 64 MiB physical
        ),
        cost_estimate=pl.CostEstimate(
            flops=flops, transcendentals=0, bytes_accessed=bytes_accessed),
    )(x, w1, b1, w2, b2, w3, b3)
    return out[:B, :n_out]


# ---------------------------------------------------------------------------
# Parameters (PyTorch layout: weight (out, in), bias (out,))
# ---------------------------------------------------------------------------
def init_params(key, input_neurons, output_neurons):
    ks = jax.random.split(key, 6)
    return {
        "fc1_w": 0.05 * jax.random.normal(ks[0], (512, input_neurons), jnp.float32),
        "fc1_b": 0.05 * jax.random.normal(ks[1], (512,), jnp.float32),
        "fc2_w": 0.05 * jax.random.normal(ks[2], (256, 512), jnp.float32),
        "fc2_b": 0.05 * jax.random.normal(ks[3], (256,), jnp.float32),
        "fc3_w": 0.05 * jax.random.normal(ks[4], (output_neurons, 256), jnp.float32),
        "fc3_b": 0.05 * jax.random.normal(ks[5], (output_neurons,), jnp.float32),
    }


# ---------------------------------------------------------------------------
# Pure-JAX reference with the same bf16-input / f32-accumulate precision policy.
# ---------------------------------------------------------------------------
def reference_forward(params, x):
    f = lambda a: a.astype(jnp.bfloat16).astype(jnp.float32)
    # TODO(synk): F.dropout(p=0.5) is stochastic in training mode; modeled as identity (eval).
    y1 = f(x) @ f(params["fc1_w"]).T + params["fc1_b"]
    y2 = jnp.maximum(y1, 0.0)
    y3 = f(y2) @ f(params["fc2_w"]).T + params["fc2_b"]
    y4 = jnp.maximum(y3, 0.0)
    y5 = f(y4) @ f(params["fc3_w"]).T + params["fc3_b"]
    return y5


if __name__ == "__main__":
    # Image batch (batch, C, H, W) flattened to (batch, C*H*W) per the module docstring.
    B, C, H, W = 2, 4, 16, 16
    input_neurons = C * H * W        # 1024
    output_neurons = 10

    key = jax.random.PRNGKey(0)
    kx, kp = jax.random.split(key)
    x_img = jax.random.normal(kx, (B, C, H, W), jnp.float32)
    x = x_img.reshape(B, input_neurons)
    params = init_params(kp, input_neurons, output_neurons)

    packed = prepare_params(params)              # one-time weight packing (outside forward)
    out = jax.block_until_ready(mlp_forward(packed, x))
    ref = jax.block_until_ready(reference_forward(params, x))

    assert out.shape == (B, output_neurons)
    np.testing.assert_allclose(np.asarray(out), np.asarray(ref), rtol=2e-2, atol=2e-2)
    print("KERNEL_OK")
</pallas_src>

<mosaic_0001>
module attributes {stable_mosaic.version = 11 : i64} {
  func.func @_mlp_fused_kernel(%arg0: i32, %arg1: memref<16x1024xf32, #tpu.memory_space<vmem>>, %arg2: memref<1024x512xbf16, #tpu.memory_space<vmem>>, %arg3: memref<1x512xf32, #tpu.memory_space<vmem>>, %arg4: memref<512x256xbf16, #tpu.memory_space<vmem>>, %arg5: memref<1x256xf32, #tpu.memory_space<vmem>>, %arg6: memref<256x128xbf16, #tpu.memory_space<vmem>>, %arg7: memref<1x128xf32, #tpu.memory_space<vmem>>, %arg8: memref<16x128xf32, #tpu.memory_space<vmem>>) attributes {dimension_semantics = [#tpu.dimension_semantics<parallel>], iteration_bounds = array<i64: 1>, scalar_prefetch = 0 : i64, scratch_operands = 0 : i64, tpu.core_type = #tpu.core_type<tc>, window_params = [{transform_indices = @transform_0, window_bounds = array<i64: 16, 1024>}, {pipeline_mode = #tpu.pipeline_mode<synchronous>, transform_indices = @transform_1, window_bounds = array<i64: 1024, 512>}, {pipeline_mode = #tpu.pipeline_mode<synchronous>, transform_indices = @transform_2, window_bounds = array<i64: 1, 512>}, {pipeline_mode = #tpu.pipeline_mode<synchronous>, transform_indices = @transform_3, window_bounds = array<i64: 512, 256>}, {pipeline_mode = #tpu.pipeline_mode<synchronous>, transform_indices = @transform_4, window_bounds = array<i64: 1, 256>}, {pipeline_mode = #tpu.pipeline_mode<synchronous>, transform_indices = @transform_5, window_bounds = array<i64: 256, 128>}, {pipeline_mode = #tpu.pipeline_mode<synchronous>, transform_indices = @transform_6, window_bounds = array<i64: 1, 128>}, {transform_indices = @transform_7, window_bounds = array<i64: 16, 128>}]} {
    %c0 = arith.constant 0 : index
    %c0_0 = arith.constant 0 : index
    %0 = vector.load %arg1[%c0, %c0_0] : memref<16x1024xf32, #tpu.memory_space<vmem>>, vector<16x1024xf32>
    %1 = arith.truncf %0 : vector<16x1024xf32> to vector<16x1024xbf16>
    %c0_1 = arith.constant 0 : index
    %c0_2 = arith.constant 0 : index
    %2 = vector.load %arg2[%c0_1, %c0_2] : memref<1024x512xbf16, #tpu.memory_space<vmem>>, vector<1024x512xbf16>
    %cst = arith.constant dense<0.000000e+00> : vector<16x512xf32>
    %3 = tpu.matmul %1, %2, %cst {dimension_numbers = #tpu.dot_dimension_numbers<[1], [0], [0], [1], [0, 0, 1, 1], [], []>} : vector<16x1024xbf16>, vector<1024x512xbf16>, vector<16x512xf32> -> vector<16x512xf32>
    %c0_3 = arith.constant 0 : index
    %c0_4 = arith.constant 0 : index
    %4 = vector.load %arg3[%c0_3, %c0_4] : memref<1x512xf32, #tpu.memory_space<vmem>>, vector<1x512xf32>
    %5 = vector.broadcast %4 : vector<1x512xf32> to vector<16x512xf32>
    %6 = arith.addf %3, %5 : vector<16x512xf32>
    %cst_5 = arith.constant 0.000000e+00 : f32
    %7 = vector.broadcast %cst_5 : f32 to vector<16x512xf32>
    %8 = arith.maximumf %6, %7 : vector<16x512xf32>
    %9 = arith.truncf %8 : vector<16x512xf32> to vector<16x512xbf16>
    %c0_6 = arith.constant 0 : index
    %c0_7 = arith.constant 0 : index
    %10 = vector.load %arg4[%c0_6, %c0_7] : memref<512x256xbf16, #tpu.memory_space<vmem>>, vector<512x256xbf16>
    %cst_8 = arith.constant dense<0.000000e+00> : vector<16x256xf32>
    %11 = tpu.matmul %9, %10, %cst_8 {dimension_numbers = #tpu.dot_dimension_numbers<[1], [0], [0], [1], [0, 0, 1, 1], [], []>} : vector<16x512xbf16>, vector<512x256xbf16>, vector<16x256xf32> -> vector<16x256xf32>
    %c0_9 = arith.constant 0 : index
    %c0_10 = arith.constant 0 : index
    %12 = vector.load %arg5[%c0_9, %c0_10] : memref<1x256xf32, #tpu.memory_space<vmem>>, vector<1x256xf32>
    %13 = vector.broadcast %12 : vector<1x256xf32> to vector<16x256xf32>
    %14 = arith.addf %11, %13 : vector<16x256xf32>
    %cst_11 = arith.constant 0.000000e+00 : f32
    %15 = vector.broadcast %cst_11 : f32 to vector<16x256xf32>
    %16 = arith.maximumf %14, %15 : vector<16x256xf32>
    %17 = arith.truncf %16 : vector<16x256xf32> to vector<16x256xbf16>
    %c0_12 = arith.constant 0 : index
    %c0_13 = arith.constant 0 : index
    %18 = vector.load %arg6[%c0_12, %c0_13] : memref<256x128xbf16, #tpu.memory_space<vmem>>, vector<256x128xbf16>
    %cst_14 = arith.constant dense<0.000000e+00> : vector<16x128xf32>
    %19 = tpu.matmul %17, %18, %cst_14 {dimension_numbers = #tpu.dot_dimension_numbers<[1], [0], [0], [1], [0, 0, 1, 1], [], []>} : vector<16x256xbf16>, vector<256x128xbf16>, vector<16x128xf32> -> vector<16x128xf32>
    %c0_15 = arith.constant 0 : index
    %c0_16 = arith.constant 0 : index
    %20 = vector.load %arg7[%c0_15, %c0_16] : memref<1x128xf32, #tpu.memory_space<vmem>>, vector<1x128xf32>
    %21 = vector.broadcast %20 : vector<1x128xf32> to vector<16x128xf32>
    %22 = arith.addf %19, %21 : vector<16x128xf32>
    %c0_17 = arith.constant 0 : index
    %c0_18 = arith.constant 0 : index
    %23 = vector.load %arg8[%c0_17, %c0_18] : memref<16x128xf32, #tpu.memory_space<vmem>>, vector<16x128xf32>
    tpu.vector_store %arg8[%c0_17, %c0_18], %22 {strides = array<i32>} : memref<16x128xf32, #tpu.memory_space<vmem>>, vector<16x128xf32>,
    return
  }
  func.func @transform_0(%arg0: i32) -> (i32, i32) {
    %c0_i32 = arith.constant 0 : i32
    %c0_i32_0 = arith.constant 0 : i32
    return %arg0, %c0_i32 : i32, i32
  }
  func.func @transform_1(%arg0: i32) -> (i32, i32) {
    %c0_i32 = arith.constant 0 : i32
    %c0_i32_0 = arith.constant 0 : i32
    %c0_i32_1 = arith.constant 0 : i32
    return %c0_i32, %c0_i32_0 : i32, i32
  }
  func.func @transform_2(%arg0: i32) -> (i32, i32) {
    %c0_i32 = arith.constant 0 : i32
    %c0_i32_0 = arith.constant 0 : i32
    %c0_i32_1 = arith.constant 0 : i32
    return %c0_i32, %c0_i32_0 : i32, i32
  }
  func.func @transform_3(%arg0: i32) -> (i32, i32) {
    %c0_i32 = arith.constant 0 : i32
    %c0_i32_0 = arith.constant 0 : i32
    %c0_i32_1 = arith.constant 0 : i32
    return %c0_i32, %c0_i32_0 : i32, i32
  }
  func.func @transform_4(%arg0: i32) -> (i32, i32) {
    %c0_i32 = arith.constant 0 : i32
    %c0_i32_0 = arith.constant 0 : i32
    %c0_i32_1 = arith.constant 0 : i32
    return %c0_i32, %c0_i32_0 : i32, i32
  }
  func.func @transform_5(%arg0: i32) -> (i32, i32) {
    %c0_i32 = arith.constant 0 : i32
    %c0_i32_0 = arith.constant 0 : i32
    %c0_i32_1 = arith.constant 0 : i32
    return %c0_i32, %c0_i32_0 : i32, i32
  }
  func.func @transform_6(%arg0: i32) -> (i32, i32) {
    %c0_i32 = arith.constant 0 : i32
    %c0_i32_0 = arith.constant 0 : i32
    %c0_i32_1 = arith.constant 0 : i32
    return %c0_i32, %c0_i32_0 : i32, i32
  }
  func.func @transform_7(%arg0: i32) -> (i32, i32) {
    %c0_i32 = arith.constant 0 : i32
    %c0_i32_0 = arith.constant 0 : i32
    return %arg0, %c0_i32 : i32, i32
  }
}

</mosaic_0001>

<bundles_post_ra>
// kernel: tpu_custom_call.1
= control target key start
LH: loop header
LB: loop body
LE: loop exit
PB: predicated region body
PF: predicated region fallthrough
CT: control target
= control target key end

     0   :  { %12 = vsyncpa [#allocation3], 0  ;;  %s3848_s0 = inlined_call_operand.hbm [shape: f32[16,1024], index: 0, kind: input, shape index: {}]   ;;  %s3849_s1 = inlined_call_operand.hbm [shape: bf16[1024,512], index: 1, kind: input, shape index: {}]   ;;  %s3850_s2 = inlined_call_operand.hbm [shape: f32[1,512], index: 2, kind: input, shape index: {}]   ;;  %s3851_s3 = inlined_call_operand.hbm [shape: bf16[512,256], index: 3, kind: input, shape index: {}]   ;;  %s3852_s4 = inlined_call_operand.vmem [shape: f32[1,256], index: 4, kind: input, shape index: {}]   ;;  %s3853_s5 = inlined_call_operand.hbm [shape: bf16[256,128], index: 5, kind: input, shape index: {}]   ;;  %s3854_s6 = inlined_call_operand.vmem [shape: f32[1,128], index: 6, kind: input, shape index: {}]   ;;  %s3855_s7 = inlined_call_operand.hbm [shape: f32[16,128], index: 7, kind: output, shape index: {}]  }
   0x1   :  { %13 = vsyncpa [#allocation6], 0 }
   0x2   :  { %14 = vsyncpa [#allocation9], 0 }
   0x3   :  { %15 = vsyncpa [#allocation4], 0  ;;  %s3713_s24 = smov [#allocation5]  }
   0x4   :  { %s33_s25 = sshll.u32 %s3713_s24, 4  ;;  %s34_s25 = int_to_ptr.vmem [resolvable:$true] %s33_s25 }
   0x5   :  { %s3593_s26 = scalar_lea.vmem %s34_s25, 32768  ;;  %p3598_p1 = scmp.lt.s32.totalorder %s34_s25, %s34_s25 }
   0x6   :  { %p3594_p0 = scmp.ne.s32.totalorder %s34_s25, %s3593_s26  ;;  %p3599_p2 = scmp.lt.s32.totalorder %s3593_s26, %s3593_s26 }
   0x8   :  { %p3600_p3 = por %p3599_p2, %p3598_p1 }
   0xa   :  { %p3601_p4 = pnand %p3600_p3, %p3594_p0 }
   0xc   :  { %3604 = shalt.err (!%p3601_p4)
}
   0xd   :  { %s3714_s27 = smov 256   ;;  %s3715_s28 = smov 16  }
   0xe   :  { %39 = dma.hbm_to_vmem [thread:$0]  %s3849_s1, 32768, %s34_s25, [#allocation6], %s3714_s27, %s3714_s27, %s3715_s28  }
   0xf   :  { %s3716_s8 = smov [#allocation8]  }
  0x10   :  { %s55_s9 = sshll.u32 %s3716_s8, 4  ;;  %s56_s9 = int_to_ptr.vmem [resolvable:$true] %s55_s9 }
  0x11   :  { %s3613_s10 = scalar_lea.vmem %s56_s9, 8192  ;;  %p3618_p6 = scmp.lt.s32.totalorder %s56_s9, %s56_s9 }
  0x12   :  { %p3614_p5 = scmp.ne.s32.totalorder %s56_s9, %s3613_s10  ;;  %p3619_p7 = scmp.lt.s32.totalorder %s3613_s10, %s3613_s10 }
  0x14   :  { %p3620_p8 = por %p3619_p7, %p3618_p6 }
  0x16   :  { %p3621_p9 = pnand %p3620_p8, %p3614_p5 }
  0x18   :  { %3624 = shalt.err (!%p3621_p9)
}
  0x19   :  { %s3717_s11 = smov 128   ;;  %s3718_s12 = smov 8  }
  0x1a   :  { %61 = dma.hbm_to_vmem [thread:$0]  %s3851_s3, 8192, %s56_s9, [#allocation9], %s3717_s11, %s3717_s11, %s3718_s12  }
  0x1b   :  { %s3719_s1 = smov [#allocation2]  }
  0x1c   :  { %s21_s15 = sshll.u32 %s3719_s1, 4  ;;  %s22_s15 = int_to_ptr.vmem [resolvable:$true] %s21_s15 }
  0x1d   :  { %s3633_s16 = scalar_lea.vmem %s22_s15, 2048  ;;  %p3638_p11 = scmp.lt.s32.totalorder %s22_s15, %s22_s15 }
  0x1e   :  { %p3634_p10 = scmp.ne.s32.totalorder %s22_s15, %s3633_s16  ;;  %p3639_p12 = scmp.lt.s32.totalorder %s3633_s16, %s3633_s16 }
  0x20   :  { %p3640_p13 = por %p3639_p12, %p3638_p11 }
  0x22   :  { %p3641_p0 = pnand %p3640_p13, %p3634_p10 }
  0x24   :  { %3644 = shalt.err (!%p3641_p0)
}
  0x25   :  { %s3720_s17 = smov 1024   ;;  %s3721_s18 = smov 64  }
  0x26   :  { %27 = dma.hbm_to_vmem [thread:$0]  %s3848_s0, 2048, %s22_s15, [#allocation3], %s3720_s17, %s3720_s17, %s3721_s18  }
  0x27   :  { %s3722_s21 = smov [#allocation7]   ;;  %s3723_s3 = smov [#allocation10]  }
  0x28   :  { %s46_s22 = sshll.u32 %s3722_s21, 4  ;;  %s69_s23 = sshll.u32 %s3723_s3, 4  ;;  %s47_s22 = int_to_ptr.vmem [resolvable:$true] %s46_s22  ;;  %s70_s23 = int_to_ptr.vmem [resolvable:$true] %s69_s23 }
  0x29   :  { %s3653_s24 = scalar_lea.vmem %s47_s22, 64  ;;  %p3658_p2 = scmp.lt.s32.totalorder %s47_s22, %s47_s22 }
  0x2a   :  { %p3654_p1 = scmp.ne.s32.totalorder %s47_s22, %s3653_s24  ;;  %p3659_p3 = scmp.lt.s32.totalorder %s3653_s24, %s3653_s24 }
  0x2c   :  { %p3660_p4 = por %p3659_p3, %p3658_p2 }
  0x2e   :  { %p3661_p5 = pnand %p3660_p4, %p3654_p1 }
  0x30   :  { %3664 = shalt.err (!%p3661_p5)
}
  0x31   :  { %49 = dma.hbm_to_vmem [thread:$0]  %s3850_s2, 64, %s47_s22, [#allocation6]  }
  0x32   :  { %s3673_s27 = scalar_lea.vmem %s70_s23, 2048  ;;  %p3678_p7 = scmp.lt.s32.totalorder %s70_s23, %s70_s23 }
  0x33   :  { %p3674_p6 = scmp.ne.s32.totalorder %s70_s23, %s3673_s27  ;;  %p3679_p8 = scmp.lt.s32.totalorder %s3673_s27, %s3673_s27 }
  0x35   :  { %p3680_p9 = por %p3679_p8, %p3678_p7 }
  0x37   :  { %p3681_p10 = pnand %p3680_p9, %p3674_p6 }
  0x39   :  { %3684 = shalt.err (!%p3681_p10)
}
  0x3a   :  { %s3724_s0 = smov 4  }
  0x3b   :  { %75 = dma.hbm_to_vmem [thread:$0]  %s3853_s5, 2048, %s70_s23, [#allocation9], %s3721_s18, %s3721_s18, %s3724_s0  }
  0x3c   :  { %3705 = dma.done.wait [#allocation3], 2048  }
  0x3d   :  { %3706 = vsyncadd [#allocation3], 4294965248 }
  0x3e   :  { %3707 = dma.done.wait [#allocation6], 32832  }
  0x3f   :  { %3708 = vsyncadd [#allocation6], 4294934464 }
  0x40   :  { %3709 = dma.done.wait [#allocation9], 10240  }
  0x41   :  { %3710 = vsyncadd [#allocation9], 4294957056  ;;  %v3089_v0 = vld [vmem:[#allocation5 + $0xe4] ss:$16 sps:$4 sm:$0xff]   ;;  %v3093_v2 = vld [vmem:[#allocation5 + $0xe0] ss:$16 sps:$4 sm:$0xff]  }
  0x42   :  { %v3091_v1 = vld [vmem:[#allocation5 + $0x2e4] ss:$16 sps:$4 sm:$0xff]   ;;  %1676 = vmatprep.subr.bf16.mxu0 %v3089_v0  ;;  %v3094_v3 = vld [vmem:[#allocation5 + $0x2e0] ss:$16 sps:$4 sm:$0xff]   ;;  %v95_v46 = vld [vmem:[#allocation2 + $0x8] sm:$0xff]  ;;  %s3725_s8 = smov [#allocation11]  }
  0x43   :  { %1719 = vmatprep.subr.bf16.mxu1 %v3091_v1  ;;  %v3095_v4 = vld [vmem:[#allocation5 + $0xc4] ss:$16 sps:$4 sm:$0xff]   ;;  %1677 = vmatpush1.bf16.msra.mxu0 %v3093_v2  ;;  %v3099_v6 = vld [vmem:[#allocation5 + $0xc0] ss:$16 sps:$4 sm:$0xff]   ;;  %v103_v47 = vld [vmem:[#allocation2 + $0x48] sm:$0xff]  ;;  %s2703_s9 = sshll.u32 %s3725_s8, 4  ;;  %s2704_s9 = int_to_ptr.vmem [resolvable:$true] %s2703_s9 }
  0x44   :  { %1720 = vmatpush1.bf16.msra.mxu1 %v3094_v3  ;;  %v3097_v5 = vld [vmem:[#allocation5 + $0x2c4] ss:$16 sps:$4 sm:$0xff]   ;;  %1678 = vmatprep.subr.bf16.mxu0 %v3095_v4  ;;  %v3100_v7 = vld [vmem:[#allocation5 + $0x2c0] ss:$16 sps:$4 sm:$0xff]   ;;  %v97_v48 = vld [vmem:[#allocation2 + $0x18] sm:$0xff]  ;;  %v3784_v53 = vpack.c.bf16 %v103_v47, %v95_v46  ;;  %s3685_s10 = scalar_lea.vmem %s2704_s9, 256  ;;  %p3690_p12 = scmp.lt.s32.totalorder %s2704_s9, %s2704_s9 }
  0x45   :  { %1721 = vmatprep.subr.bf16.mxu1 %v3097_v5  ;;  %v3101_v8 = vld [vmem:[#allocation5 + $0xa4] ss:$16 sps:$4 sm:$0xff]   ;;  %v3105_v10 = vld [vmem:[#allocation5 + $0xa0] ss:$16 sps:$4 sm:$0xff]   ;;  %v105_v49 = vld [vmem:[#allocation2 + $0x58] sm:$0xff]  ;;  %p3686_p11 = scmp.ne.s32.totalorder %s2704_s9, %s3685_s10  ;;  %p3691_p13 = scmp.lt.s32.totalorder %s3685_s10, %s3685_s10 }
  0x46   :  { %v3103_v9 = vld [vmem:[#allocation5 + $0x2a4] ss:$16 sps:$4 sm:$0xff]   ;;  %v3106_v11 = vld [vmem:[#allocation5 + $0x2a0] ss:$16 sps:$4 sm:$0xff]   ;;  %v3786_v54 = vpack.c.bf16 %v105_v49, %v97_v48  ;;  %1708 = vmatprep.mubr.bf16.mxu0 %v3784_v53  ;;  %v109_v46 = vld [vmem:[#allocation2 + $0x78] sm:$0xff] }
  0x47   :  { %1679 = vmatpush1.bf16.msra.mxu0 %v3099_v6  ;;  %v3107_v12 = vld [vmem:[#allocation5 + $0x84] ss:$16 sps:$4 sm:$0xff]   ;;  %v3111_v14 = vld [vmem:[#allocation5 + $0x80] ss:$16 sps:$4 sm:$0xff]   ;;  %p3692_p0 = por %p3691_p13, %p3690_p12 }
  0x48   :  { %1722 = vmatpush1.bf16.msra.mxu1 %v3100_v7  ;;  %1680 = vmatprep.subr.bf16.mxu0 %v3101_v8  ;;  %v3109_v13 = vld [vmem:[#allocation5 + $0x284] ss:$16 sps:$4 sm:$0xff]   ;;  %v3112_v15 = vld [vmem:[#allocation5 + $0x280] ss:$16 sps:$4 sm:$0xff]  }
  0x49   :  { %1723 = vmatprep.subr.bf16.mxu1 %v3103_v9  ;;  %v3113_v16 = vld [vmem:[#allocation5 + $0x64] ss:$16 sps:$4 sm:$0xff]   ;;  %v3117_v18 = vld [vmem:[#allocation5 + $0x60] ss:$16 sps:$4 sm:$0xff]   ;;  %1751 = vmatprep.mubr.bf16.mxu1 %v3786_v54  ;;  %p3693_p1 = pnand %p3692_p0, %p3686_p11 }
  0x4a   :  { %v3115_v17 = vld [vmem:[#allocation5 + $0x264] ss:$16 sps:$4 sm:$0xff]   ;;  %v3118_v19 = vld [vmem:[#allocation5 + $0x260] ss:$16 sps:$4 sm:$0xff]  }
  0x4b   :  { %1681 = vmatpush1.bf16.msra.mxu0 %v3105_v10  ;;  %v3119_v20 = vld [vmem:[#allocation5 + $0x44] ss:$16 sps:$4 sm:$0xff]   ;;  %v3123_v22 = vld [vmem:[#allocation5 + $0x40] ss:$16 sps:$4 sm:$0xff]  }
  0x4c   :  { %1724 = vmatpush1.bf16.msra.mxu1 %v3106_v11  ;;  %1682 = vmatprep.subr.bf16.mxu0 %v3107_v12  ;;  %v3121_v21 = vld [vmem:[#allocation5 + $0x244] ss:$16 sps:$4 sm:$0xff]   ;;  %v3124_v23 = vld [vmem:[#allocation5 + $0x240] ss:$16 sps:$4 sm:$0xff]  }
  0x4d   :  { %1725 = vmatprep.subr.bf16.mxu1 %v3109_v13  ;;  %v3125_v24 = vld [vmem:[#allocation5 + $0x24] ss:$16 sps:$4 sm:$0xff]   ;;  %v3129_v26 = vld [vmem:[#allocation5 + $0x20] ss:$16 sps:$4 sm:$0xff]  }
  0x4e   :  { %v3127_v25 = vld [vmem:[#allocation5 + $0x224] ss:$16 sps:$4 sm:$0xff]   ;;  %v3130_v27 = vld [vmem:[#allocation5 + $0x220] ss:$16 sps:$4 sm:$0xff]  }
  0x4f   :  { %1683 = vmatpush1.bf16.msra.mxu0 %v3111_v14  ;;  %v3131_v28 = vld [vmem:[#allocation5 + $0x4] ss:$16 sps:$4 sm:$0xff]   ;;  %v3135_v30 = vld [vmem:[#allocation5] ss:$16 sps:$4 sm:$0xff]  }
  0x50   :  { %1726 = vmatpush1.bf16.msra.mxu1 %v3112_v15  ;;  %1684 = vmatprep.subr.bf16.mxu0 %v3113_v16  ;;  %v3133_v29 = vld [vmem:[#allocation5 + $0x204] ss:$16 sps:$4 sm:$0xff]   ;;  %v3136_v31 = vld [vmem:[#allocation5 + $0x200] ss:$16 sps:$4 sm:$0xff]  }
  0x51   :  { %1727 = vmatprep.subr.bf16.mxu1 %v3115_v17  ;;  %v3137_v32 = vld [vmem:[#allocation5 + $0x1e4] ss:$16 sps:$4 sm:$0xff]   ;;  %v3141_v34 = vld [vmem:[#allocation5 + $0x1e0] ss:$16 sps:$4 sm:$0xff]  }
  0x52   :  { %v3139_v33 = vld [vmem:[#allocation5 + $0x3e4] ss:$16 sps:$4 sm:$0xff]   ;;  %v3142_v35 = vld [vmem:[#allocation5 + $0x3e0] ss:$16 sps:$4 sm:$0xff]  }
  0x53   :  { %1685 = vmatpush1.bf16.msra.mxu0 %v3117_v18  ;;  %v3143_v36 = vld [vmem:[#allocation5 + $0x1c4] ss:$16 sps:$4 sm:$0xff]   ;;  %v3147_v38 = vld [vmem:[#allocation5 + $0x1c0] ss:$16 sps:$4 sm:$0xff]  }
  0x54   :  { %1728 = vmatpush1.bf16.msra.mxu1 %v3118_v19  ;;  %1686 = vmatprep.subr.bf16.mxu0 %v3119_v20  ;;  %v3145_v37 = vld [vmem:[#allocation5 + $0x3c4] ss:$16 sps:$4 sm:$0xff]   ;;  %v3148_v39 = vld [vmem:[#allocation5 + $0x3c0] ss:$16 sps:$4 sm:$0xff]  }
  0x55   :  { %1729 = vmatprep.subr.bf16.mxu1 %v3121_v21  ;;  %v3149_v40 = vld [vmem:[#allocation5 + $0x1a4] ss:$16 sps:$4 sm:$0xff]   ;;  %v3153_v42 = vld [vmem:[#allocation5 + $0x1a0] ss:$16 sps:$4 sm:$0xff]  }
  0x56   :  { %v3151_v41 = vld [vmem:[#allocation5 + $0x3a4] ss:$16 sps:$4 sm:$0xff]   ;;  %v3154_v43 = vld [vmem:[#allocation5 + $0x3a0] ss:$16 sps:$4 sm:$0xff]  }
  0x57   :  { %1687 = vmatpush1.bf16.msra.mxu0 %v3123_v22  ;;  %v3155_v44 = vld [vmem:[#allocation5 + $0x184] ss:$16 sps:$4 sm:$0xff]   ;;  %v3159_v50 = vld [vmem:[#allocation5 + $0x180] ss:$16 sps:$4 sm:$0xff]  }
  0x58   :  { %1730 = vmatpush1.bf16.msra.mxu1 %v3124_v23  ;;  %1688 = vmatprep.subr.bf16.mxu0 %v3125_v24  ;;  %v3157_v45 = vld [vmem:[#allocation5 + $0x384] ss:$16 sps:$4 sm:$0xff]   ;;  %v3160_v51 = vld [vmem:[#allocation5 + $0x380] ss:$16 sps:$4 sm:$0xff]  }
  0x59   :  { %1731 = vmatprep.subr.bf16.mxu1 %v3127_v25  ;;  %v3161_v52 = vld [vmem:[#allocation5 + $0x164] ss:$16 sps:$4 sm:$0xff]   ;;  %v3165_v56 = vld [vmem:[#allocation5 + $0x160] ss:$16 sps:$4 sm:$0xff]  }
  0x5a   :  { %v3163_v55 = vld [vmem:[#allocation5 + $0x364] ss:$16 sps:$4 sm:$0xff]   ;;  %v3166_v57 = vld [vmem:[#allocation5 + $0x360] ss:$16 sps:$4 sm:$0xff]  }
  0x5b   :  { %1689 = vmatpush1.bf16.msra.mxu0 %v3129_v26  ;;  %v3167_v58 = vld [vmem:[#allocation5 + $0x144] ss:$16 sps:$4 sm:$0xff]   ;;  %v3171_v60 = vld [vmem:[#allocation5 + $0x140] ss:$16 sps:$4 sm:$0xff]  }
  0x5c   :  { %1732 = vmatpush1.bf16.msra.mxu1 %v3130_v27  ;;  %1690 = vmatprep.subr.bf16.mxu0 %v3131_v28  ;;  %v3169_v59 = vld [vmem:[#allocation5 + $0x344] ss:$16 sps:$4 sm:$0xff]   ;;  %v3172_v61 = vld [vmem:[#allocation5 + $0x340] ss:$16 sps:$4 sm:$0xff]  }
  0x5d   :  { %1733 = vmatprep.subr.bf16.mxu1 %v3133_v29  ;;  %v3173_v62 = vld [vmem:[#allocation5 + $0x124] ss:$16 sps:$4 sm:$0xff]   ;;  %v3177_v0 = vld [vmem:[#allocation5 + $0x120] ss:$16 sps:$4 sm:$0xff]  }
  0x5e   :  { %v3175_v63 = vld [vmem:[#allocation5 + $0x324] ss:$16 sps:$4 sm:$0xff]   ;;  %v3178_v1 = vld [vmem:[#allocation5 + $0x320] ss:$16 sps:$4 sm:$0xff]  }
  0x5f   :  { %1691 = vmatpush1.bf16.msra.mxu0 %v3135_v30  ;;  %v3179_v2 = vld [vmem:[#allocation5 + $0x104] ss:$16 sps:$4 sm:$0xff]   ;;  %v3183_v4 = vld [vmem:[#allocation5 + $0x100] ss:$16 sps:$4 sm:$0xff]  }
  0x60   :  { %1734 = vmatpush1.bf16.msra.mxu1 %v3136_v31  ;;  %1692 = vmatprep.subr.bf16.mxu0 %v3137_v32  ;;  %v3181_v3 = vld [vmem:[#allocation5 + $0x304] ss:$16 sps:$4 sm:$0xff]   ;;  %v3184_v5 = vld [vmem:[#allocation5 + $0x300] ss:$16 sps:$4 sm:$0xff]  }
  0x61   :  { %1735 = vmatprep.subr.bf16.mxu1 %v3139_v33  ;;  %v94_v6 = vld [vmem:[#allocation2] sm:$0xff]  ;;  %v96_v8 = vld [vmem:[#allocation2 + $0x10] sm:$0xff] }
  0x62   :  { %v102_v7 = vld [vmem:[#allocation2 + $0x40] sm:$0xff]  ;;  %v104_v9 = vld [vmem:[#allocation2 + $0x50] sm:$0xff] }
  0x63   :  { %1693 = vmatpush2.bf16.msra.mxu0 %v3141_v34  ;;  %v3187_v10 = vld [vmem:[#allocation5 + $0x4e4] ss:$16 sps:$4 sm:$0xff]   ;;  %v3790_v12 = vpack.c.bf16 %v102_v7, %v94_v6  ;;  %v3792_v13 = vpack.c.bf16 %v104_v9, %v96_v8  ;;  %v3185_v14 = vld [vmem:[#allocation5 + $0x4e0] ss:$16 sps:$4 sm:$0xff]  }
  0x64   :  { %1736 = vmatpush2.bf16.msra.mxu1 %v3142_v35  ;;  %1694 = vmatprep.subr.bf16.mxu0 %v3143_v36  ;;  %v3190_v11 = vld [vmem:[#allocation5 + $0x6e4] ss:$16 sps:$4 sm:$0xff]   ;;  %v3188_v15 = vld [vmem:[#allocation5 + $0x6e0] ss:$16 sps:$4 sm:$0xff]  }
  0x65   :  { %1737 = vmatprep.subr.bf16.mxu1 %v3145_v37  ;;  %v3193_v16 = vld [vmem:[#allocation5 + $0x4c4] ss:$16 sps:$4 sm:$0xff]   ;;  %v3191_v18 = vld [vmem:[#allocation5 + $0x4c0] ss:$16 sps:$4 sm:$0xff]  }
  0x66   :  { %v3196_v17 = vld [vmem:[#allocation5 + $0x6c4] ss:$16 sps:$4 sm:$0xff]   ;;  %v3194_v19 = vld [vmem:[#allocation5 + $0x6c0] ss:$16 sps:$4 sm:$0xff]  }
  0x67   :  { %1695 = vmatpush2.bf16.msra.mxu0 %v3147_v38  ;;  %v3199_v20 = vld [vmem:[#allocation5 + $0x4a4] ss:$16 sps:$4 sm:$0xff]   ;;  %v3197_v22 = vld [vmem:[#allocation5 + $0x4a0] ss:$16 sps:$4 sm:$0xff]  }
  0x68   :  { %1738 = vmatpush2.bf16.msra.mxu1 %v3148_v39  ;;  %1696 = vmatprep.subr.bf16.mxu0 %v3149_v40  ;;  %v3202_v21 = vld [vmem:[#allocation5 + $0x6a4] ss:$16 sps:$4 sm:$0xff]   ;;  %v3200_v23 = vld [vmem:[#allocation5 + $0x6a0] ss:$16 sps:$4 sm:$0xff]   ;;  %v99_v40 = vld [vmem:[#allocation2 + $0x28] sm:$0xff] }
  0x69   :  { %1739 = vmatprep.subr.bf16.mxu1 %v3151_v41  ;;  %v3205_v24 = vld [vmem:[#allocation5 + $0x484] ss:$16 sps:$4 sm:$0xff]   ;;  %v3203_v26 = vld [vmem:[#allocation5 + $0x480] ss:$16 sps:$4 sm:$0xff]   ;;  %v107_v41 = vld [vmem:[#allocation2 + $0x68] sm:$0xff] }
  0x6a   :  { %v3208_v25 = vld [vmem:[#allocation5 + $0x684] ss:$16 sps:$4 sm:$0xff]   ;;  %v3206_v27 = vld [vmem:[#allocation5 + $0x680] ss:$16 sps:$4 sm:$0xff]  }
  0x6b   :  { %1697 = vmatpush2.bf16.msra.mxu0 %v3153_v42  ;;  %v3211_v28 = vld [vmem:[#allocation5 + $0x464] ss:$16 sps:$4 sm:$0xff]   ;;  %v3209_v30 = vld [vmem:[#allocation5 + $0x460] ss:$16 sps:$4 sm:$0xff]   ;;  %v101_v42 = vld [vmem:[#allocation2 + $0x38] sm:$0xff] }
  0x6c   :  { %1740 = vmatpush2.bf16.msra.mxu1 %v3154_v43  ;;  %1698 = vmatprep.subr.bf16.mxu0 %v3155_v44  ;;  %v3214_v29 = vld [vmem:[#allocation5 + $0x664] ss:$16 sps:$4 sm:$0xff]   ;;  %v3212_v31 = vld [vmem:[#allocation5 + $0x660] ss:$16 sps:$4 sm:$0xff]   ;;  %v3798_v47 = vpack.c.bf16 %v109_v46, %v101_v42  ;;  %v3299_v42 = vld [vmem:[#allocation5 + $0x88] ss:$16 sps:$4 sm:$0xff]  }
  0x6d   :  { %1741 = vmatprep.subr.bf16.mxu1 %v3157_v45  ;;  %v3217_v32 = vld [vmem:[#allocation5 + $0x444] ss:$16 sps:$4 sm:$0xff]   ;;  %v3215_v34 = vld [vmem:[#allocation5 + $0x440] ss:$16 sps:$4 sm:$0xff]   ;;  %v3796_v45 = vpack.c.bf16 %v107_v41, %v99_v40  ;;  %v3301_v40 = vld [vmem:[#allocation5 + $0x8c] ss:$16 sps:$4 sm:$0xff]  }
  0x6e   :  { %v3220_v33 = vld [vmem:[#allocation5 + $0x644] ss:$16 sps:$4 sm:$0xff]   ;;  %v3218_v35 = vld [vmem:[#allocation5 + $0x640] ss:$16 sps:$4 sm:$0xff]   ;;  %v3304_v41 = vld [vmem:[#allocation5 + $0x28c] ss:$16 sps:$4 sm:$0xff]  }
  0x6f   :  { %1699 = vmatpush2.bf16.msra.mxu0 %v3159_v50  ;;  %v3223_v36 = vld [vmem:[#allocation5 + $0x424] ss:$16 sps:$4 sm:$0xff]   ;;  %v3221_v38 = vld [vmem:[#allocation5 + $0x420] ss:$16 sps:$4 sm:$0xff]   ;;  %v3310_v46 = vld [vmem:[#allocation5 + $0x26c] ss:$16 sps:$4 sm:$0xff]  }
  0x70   :  { %1742 = vmatpush2.bf16.msra.mxu1 %v3160_v51  ;;  %1700 = vmatprep.subr.bf16.mxu0 %v3161_v52  ;;  %v3226_v37 = vld [vmem:[#allocation5 + $0x624] ss:$16 sps:$4 sm:$0xff]   ;;  %v3224_v39 = vld [vmem:[#allocation5 + $0x620] ss:$16 sps:$4 sm:$0xff]  }
  0x71   :  { %1743 = vmatprep.subr.bf16.mxu1 %v3163_v55  ;;  %v3229_v43 = vld [vmem:[#allocation5 + $0x404] ss:$16 sps:$4 sm:$0xff]   ;;  %v3227_v48 = vld [vmem:[#allocation5 + $0x400] ss:$16 sps:$4 sm:$0xff]  }
  0x72   :  { %v3232_v44 = vld [vmem:[#allocation5 + $0x604] ss:$16 sps:$4 sm:$0xff]   ;;  %v3230_v49 = vld [vmem:[#allocation5 + $0x600] ss:$16 sps:$4 sm:$0xff]  }
  0x73   :  { %1701 = vmatpush2.bf16.msra.mxu0 %v3165_v56  ;;  %v3235_v50 = vld [vmem:[#allocation5 + $0x5e4] ss:$16 sps:$4 sm:$0xff]   ;;  %v3233_v52 = vld [vmem:[#allocation5 + $0x5e0] ss:$16 sps:$4 sm:$0xff]  }
  0x74   :  { %1744 = vmatpush2.bf16.msra.mxu1 %v3166_v57  ;;  %1702 = vmatprep.subr.bf16.mxu0 %v3167_v58  ;;  %v3238_v51 = vld [vmem:[#allocation5 + $0x7e4] ss:$16 sps:$4 sm:$0xff]   ;;  %v3236_v55 = vld [vmem:[#allocation5 + $0x7e0] ss:$16 sps:$4 sm:$0xff]  }
  0x75   :  { %1745 = vmatprep.subr.bf16.mxu1 %v3169_v59  ;;  %v3241_v56 = vld [vmem:[#allocation5 + $0x5c4] ss:$16 sps:$4 sm:$0xff]   ;;  %v3239_v58 = vld [vmem:[#allocation5 + $0x5c0] ss:$16 sps:$4 sm:$0xff]  }
  0x76   :  { %v3244_v57 = vld [vmem:[#allocation5 + $0x7c4] ss:$16 sps:$4 sm:$0xff]   ;;  %v3242_v59 = vld [vmem:[#allocation5 + $0x7c0] ss:$16 sps:$4 sm:$0xff]  }
  0x77   :  { %1703 = vmatpush2.bf16.msra.mxu0 %v3171_v60  ;;  %v3247_v60 = vld [vmem:[#allocation5 + $0x5a4] ss:$16 sps:$4 sm:$0xff]   ;;  %v3257_v6 = vld [vmem:[#allocation5 + $0x560] ss:$16 sps:$4 sm:$0xff]  }
  0x78   :  { %1746 = vmatpush2.bf16.msra.mxu1 %v3172_v61  ;;  %1704 = vmatprep.subr.bf16.mxu0 %v3173_v62  ;;  %v3250_v61 = vld [vmem:[#allocation5 + $0x7a4] ss:$16 sps:$4 sm:$0xff]   ;;  %v3245_v62 = vld [vmem:[#allocation5 + $0x5a0] ss:$16 sps:$4 sm:$0xff]  }
  0x79   :  { %1747 = vmatprep.subr.bf16.mxu1 %v3175_v63  ;;  %v3248_v63 = vld [vmem:[#allocation5 + $0x7a0] ss:$16 sps:$4 sm:$0xff]   ;;  %v3265_v8 = vld [vmem:[#allocation5 + $0x544] ss:$16 sps:$4 sm:$0xff]  }
  0x7a   :  { %v3260_v7 = vld [vmem:[#allocation5 + $0x760] ss:$16 sps:$4 sm:$0xff]   ;;  %v3268_v9 = vld [vmem:[#allocation5 + $0x744] ss:$16 sps:$4 sm:$0xff]  }
  0x7b   :  { %1705 = vmatpush2.bf16.msra.mxu0 %v3177_v0  ;;  %v3253_v0 = vld [vmem:[#allocation5 + $0x584] ss:$16 sps:$4 sm:$0xff]  }
  0x7c   :  { %1748 = vmatpush2.bf16.msra.mxu1 %v3178_v1  ;;  %1706 = vmatprep.subr.bf16.mxu0 %v3179_v2  ;;  %v3256_v1 = vld [vmem:[#allocation5 + $0x784] ss:$16 sps:$4 sm:$0xff]   ;;  %v3251_v2 = vld [vmem:[#allocation5 + $0x580] ss:$16 sps:$4 sm:$0xff]  }
  0x7d   :  { %1749 = vmatprep.subr.bf16.mxu1 %v3181_v3  ;;  %v3254_v3 = vld [vmem:[#allocation5 + $0x780] ss:$16 sps:$4 sm:$0xff]  }
  0x7f   :  { %1707 = vmatpush2.bf16.msra.mxu0 %v3183_v4  ;;  %v3259_v4 = vld [vmem:[#allocation5 + $0x564] ss:$16 sps:$4 sm:$0xff]  }
  0x80   :  { %1750 = vmatpush2.bf16.msra.mxu1 %v3184_v5  ;;  %1762 = vmatprep.subr.bf16.mxu0 %v3187_v10  ;;  %v3262_v5 = vld [vmem:[#allocation5 + $0x764] ss:$16 sps:$4 sm:$0xff]   ;;  %v3263_v10 = vld [vmem:[#allocation5 + $0x540] ss:$16 sps:$4 sm:$0xff]  }
  0x81   :  { %1805 = vmatprep.subr.bf16.mxu1 %v3190_v11  ;;  %v3266_v11 = vld [vmem:[#allocation5 + $0x740] ss:$16 sps:$4 sm:$0xff]  }
  0x82   :  { %1709 = vmatmul.mubr.bf16.vlgmr.msra.gmra.mxu0 %v3790_v12 }
  0x83   :  { %1752 = vmatmul.mubr.bf16.vlgmr.msra.gmra.mxu1 %v3792_v13  ;;  %1763 = vmatpush1.bf16.msra.mxu0 %v3185_v14  ;;  %v3271_v14 = vld [vmem:[#allocation5 + $0x524] ss:$16 sps:$4 sm:$0xff]  }
  0x84   :  { %1806 = vmatpush1.bf16.msra.mxu1 %v3188_v15  ;;  %1764 = vmatprep.subr.bf16.mxu0 %v3193_v16  ;;  %v3274_v15 = vld [vmem:[#allocation5 + $0x724] ss:$16 sps:$4 sm:$0xff]   ;;  %v3269_v16 = vld [vmem:[#allocation5 + $0x520] ss:$16 sps:$4 sm:$0xff]  }
  0x85   :  { %1807 = vmatprep.subr.bf16.mxu1 %v3196_v17  ;;  %1794 = vmatprep.mubr.bf16.mxu0 %v3796_v45  ;;  %v3272_v17 = vld [vmem:[#allocation5 + $0x720] ss:$16 sps:$4 sm:$0xff]  }
  0x86   :  { %1837 = vmatprep.mubr.bf16.mxu1 %v3798_v47 }
  0x87   :  { %1765 = vmatpush1.bf16.msra.mxu0 %v3191_v18  ;;  %v3277_v18 = vld [vmem:[#allocation5 + $0x504] ss:$16 sps:$4 sm:$0xff]  }
  0x88   :  { %1808 = vmatpush1.bf16.msra.mxu1 %v3194_v19  ;;  %1766 = vmatprep.subr.bf16.mxu0 %v3199_v20  ;;  %v3280_v19 = vld [vmem:[#allocation5 + $0x704] ss:$16 sps:$4 sm:$0xff]   ;;  %v3275_v20 = vld [vmem:[#allocation5 + $0x500] ss:$16 sps:$4 sm:$0xff]  }
  0x89   :  { %1809 = vmatprep.subr.bf16.mxu1 %v3202_v21  ;;  %v3278_v21 = vld [vmem:[#allocation5 + $0x700] ss:$16 sps:$4 sm:$0xff]  }
  0x8b   :  { %1767 = vmatpush1.bf16.msra.mxu0 %v3197_v22  ;;  %v98_v22 = vld [vmem:[#allocation2 + $0x20] sm:$0xff] }
  0x8c   :  { %1810 = vmatpush1.bf16.msra.mxu1 %v3200_v23  ;;  %1768 = vmatprep.subr.bf16.mxu0 %v3205_v24  ;;  %v106_v23 = vld [vmem:[#allocation2 + $0x60] sm:$0xff]  ;;  %v100_v24 = vld [vmem:[#allocation2 + $0x30] sm:$0xff] }
  0x8d   :  { %1811 = vmatprep.subr.bf16.mxu1 %v3208_v25  ;;  %v108_v25 = vld [vmem:[#allocation2 + $0x70] sm:$0xff] }
  0x8f   :  { %1769 = vmatpush1.bf16.msra.mxu0 %v3203_v26  ;;  %v3283_v26 = vld [vmem:[#allocation5 + $0xec] ss:$16 sps:$4 sm:$0xff]  }
  0x90   :  { %1812 = vmatpush1.bf16.msra.mxu1 %v3206_v27  ;;  %1770 = vmatprep.subr.bf16.mxu0 %v3211_v28  ;;  %v3286_v27 = vld [vmem:[#allocation5 + $0x2ec] ss:$16 sps:$4 sm:$0xff]   ;;  %v3802_v28 = vpack.c.bf16 %v106_v23, %v98_v22  ;;  %v3359_v22 = vld [vmem:[#allocation5 + $0x148] ss:$16 sps:$4 sm:$0xff]  }
  0x91   :  { %1813 = vmatprep.subr.bf16.mxu1 %v3214_v29  ;;  %v3804_v29 = vpack.c.bf16 %v108_v25, %v100_v24  ;;  %v3362_v23 = vld [vmem:[#allocation5 + $0x348] ss:$16 sps:$4 sm:$0xff]   ;;  %v3367_v24 = vld [vmem:[#allocation5 + $0x12c] ss:$16 sps:$4 sm:$0xff]  }
  0x92   :  { %v3370_v25 = vld [vmem:[#allocation5 + $0x32c] ss:$16 sps:$4 sm:$0xff]  }
  0x93   :  { %1771 = vmatpush1.bf16.msra.mxu0 %v3209_v30  ;;  %v3281_v30 = vld [vmem:[#allocation5 + $0xe8] ss:$16 sps:$4 sm:$0xff]  }
  0x94   :  { %1814 = vmatpush1.bf16.msra.mxu1 %v3212_v31  ;;  %1772 = vmatprep.subr.bf16.mxu0 %v3217_v32  ;;  %v3284_v31 = vld [vmem:[#allocation5 + $0x2e8] ss:$16 sps:$4 sm:$0xff]   ;;  %v3289_v32 = vld [vmem:[#allocation5 + $0xcc] ss:$16 sps:$4 sm:$0xff]  }
  0x95   :  { %1815 = vmatprep.subr.bf16.mxu1 %v3220_v33  ;;  %v3292_v33 = vld [vmem:[#allocation5 + $0x2cc] ss:$16 sps:$4 sm:$0xff]  }
  0x97   :  { %1773 = vmatpush1.bf16.msra.mxu0 %v3215_v34  ;;  %v3287_v34 = vld [vmem:[#allocation5 + $0xc8] ss:$16 sps:$4 sm:$0xff]  }
  0x98   :  { %1816 = vmatpush1.bf16.msra.mxu1 %v3218_v35  ;;  %1774 = vmatprep.subr.bf16.mxu0 %v3223_v36  ;;  %v3290_v35 = vld [vmem:[#allocation5 + $0x2c8] ss:$16 sps:$4 sm:$0xff]   ;;  %v3295_v36 = vld [vmem:[#allocation5 + $0xac] ss:$16 sps:$4 sm:$0xff]  }
  0x99   :  { %1817 = vmatprep.subr.bf16.mxu1 %v3226_v37  ;;  %v3298_v37 = vld [vmem:[#allocation5 + $0x2ac] ss:$16 sps:$4 sm:$0xff]  }
  0x9b   :  { %1775 = vmatpush1.bf16.msra.mxu0 %v3221_v38  ;;  %v3293_v38 = vld [vmem:[#allocation5 + $0xa8] ss:$16 sps:$4 sm:$0xff]  }
  0x9c   :  { %1818 = vmatpush1.bf16.msra.mxu1 %v3224_v39  ;;  %1776 = vmatprep.subr.bf16.mxu0 %v3229_v43  ;;  %v3296_v39 = vld [vmem:[#allocation5 + $0x2a8] ss:$16 sps:$4 sm:$0xff]  }
  0x9d   :  { %1819 = vmatprep.subr.bf16.mxu1 %v3232_v44  ;;  %v3302_v43 = vld [vmem:[#allocation5 + $0x288] ss:$16 sps:$4 sm:$0xff]   ;;  %v3307_v44 = vld [vmem:[#allocation5 + $0x6c] ss:$16 sps:$4 sm:$0xff]  }
  0x9f   :  { %1777 = vmatpush1.bf16.msra.mxu0 %v3227_v48  ;;  %v3305_v48 = vld [vmem:[#allocation5 + $0x68] ss:$16 sps:$4 sm:$0xff]  }
  0xa0   :  { %1820 = vmatpush1.bf16.msra.mxu1 %v3230_v49  ;;  %1778 = vmatprep.subr.bf16.mxu0 %v3235_v50  ;;  %v3316_v49 = vld [vmem:[#allocation5 + $0x24c] ss:$16 sps:$4 sm:$0xff]   ;;  %v3311_v50 = vld [vmem:[#allocation5 + $0x48] ss:$16 sps:$4 sm:$0xff]  }
  0xa1   :  { %1821 = vmatprep.subr.bf16.mxu1 %v3238_v51  ;;  %v3314_v51 = vld [vmem:[#allocation5 + $0x248] ss:$16 sps:$4 sm:$0xff]  }
  0xa3   :  { %1779 = vmatpush2.bf16.msra.mxu0 %v3233_v52  ;;  %v3319_v52 = vld [vmem:[#allocation5 + $0x2c] ss:$16 sps:$4 sm:$0xff]  }
  0xa4   :  { %1822 = vmatpush2.bf16.msra.mxu1 %v3236_v55  ;;  %1780 = vmatprep.subr.bf16.mxu0 %v3241_v56  ;;  %v3322_v55 = vld [vmem:[#allocation5 + $0x22c] ss:$16 sps:$4 sm:$0xff]   ;;  %v3317_v56 = vld [vmem:[#allocation5 + $0x28] ss:$16 sps:$4 sm:$0xff]  }
  0xa5   :  { %1823 = vmatprep.subr.bf16.mxu1 %v3244_v57  ;;  %v3320_v57 = vld [vmem:[#allocation5 + $0x228] ss:$16 sps:$4 sm:$0xff]  }
  0xa7   :  { %1781 = vmatpush2.bf16.msra.mxu0 %v3239_v58  ;;  %v3325_v58 = vld [vmem:[#allocation5 + $0xc] ss:$16 sps:$4 sm:$0xff]  }
  0xa8   :  { %1824 = vmatpush2.bf16.msra.mxu1 %v3242_v59  ;;  %1782 = vmatprep.subr.bf16.mxu0 %v3247_v60  ;;  %v3328_v59 = vld [vmem:[#allocation5 + $0x20c] ss:$16 sps:$4 sm:$0xff]   ;;  %v3323_v60 = vld [vmem:[#allocation5 + $0x8] ss:$16 sps:$4 sm:$0xff]  }
  0xa9   :  { %1825 = vmatprep.subr.bf16.mxu1 %v3250_v61  ;;  %v3326_v61 = vld [vmem:[#allocation5 + $0x208] ss:$16 sps:$4 sm:$0xff]  }
  0xab   :  { %1783 = vmatpush2.bf16.msra.mxu0 %v3245_v62  ;;  %v3331_v62 = vld [vmem:[#allocation5 + $0x1ec] ss:$16 sps:$4 sm:$0xff]  }
  0xac   :  { %1826 = vmatpush2.bf16.msra.mxu1 %v3248_v63  ;;  %1784 = vmatprep.subr.bf16.mxu0 %v3253_v0  ;;  %v3334_v63 = vld [vmem:[#allocation5 + $0x3ec] ss:$16 sps:$4 sm:$0xff]   ;;  %v3329_v0 = vld [vmem:[#allocation5 + $0x1e8] ss:$16 sps:$4 sm:$0xff]  }
  0xad   :  { %1827 = vmatprep.subr.bf16.mxu1 %v3256_v1  ;;  %v3332_v1 = vld [vmem:[#allocation5 + $0x3e8] ss:$16 sps:$4 sm:$0xff]  }
  0xaf   :  { %1785 = vmatpush2.bf16.msra.mxu0 %v3251_v2  ;;  %v3337_v2 = vld [vmem:[#allocation5 + $0x1cc] ss:$16 sps:$4 sm:$0xff]  }
  0xb0   :  { %1828 = vmatpush2.bf16.msra.mxu1 %v3254_v3  ;;  %1786 = vmatprep.subr.bf16.mxu0 %v3259_v4  ;;  %v3340_v3 = vld [vmem:[#allocation5 + $0x3cc] ss:$16 sps:$4 sm:$0xff]   ;;  %v3335_v4 = vld [vmem:[#allocation5 + $0x1c8] ss:$16 sps:$4 sm:$0xff]  }
  0xb1   :  { %1829 = vmatprep.subr.bf16.mxu1 %v3262_v5  ;;  %v3338_v5 = vld [vmem:[#allocation5 + $0x3c8] ss:$16 sps:$4 sm:$0xff]  }
  0xb3   :  { %1787 = vmatpush2.bf16.msra.mxu0 %v3257_v6  ;;  %v3343_v6 = vld [vmem:[#allocation5 + $0x1ac] ss:$16 sps:$4 sm:$0xff]  }
  0xb4   :  { %1830 = vmatpush2.bf16.msra.mxu1 %v3260_v7  ;;  %1788 = vmatprep.subr.bf16.mxu0 %v3265_v8  ;;  %v3346_v7 = vld [vmem:[#allocation5 + $0x3ac] ss:$16 sps:$4 sm:$0xff]   ;;  %v3341_v8 = vld [vmem:[#allocation5 + $0x1a8] ss:$16 sps:$4 sm:$0xff]  }
  0xb5   :  { %1831 = vmatprep.subr.bf16.mxu1 %v3268_v9  ;;  %v3344_v9 = vld [vmem:[#allocation5 + $0x3a8] ss:$16 sps:$4 sm:$0xff]  }
  0xb7   :  { %1789 = vmatpush2.bf16.msra.mxu0 %v3263_v10  ;;  %v3349_v10 = vld [vmem:[#allocation5 + $0x18c] ss:$16 sps:$4 sm:$0xff]  }
  0xb8   :  { %1832 = vmatpush2.bf16.msra.mxu1 %v3266_v11  ;;  %1790 = vmatprep.subr.bf16.mxu0 %v3271_v14  ;;  %v3352_v11 = vld [vmem:[#allocation5 + $0x38c] ss:$16 sps:$4 sm:$0xff]   ;;  %v3347_v14 = vld [vmem:[#allocation5 + $0x188] ss:$16 sps:$4 sm:$0xff]  }
  0xb9   :  { %1833 = vmatprep.subr.bf16.mxu1 %v3274_v15  ;;  %v3350_v15 = vld [vmem:[#allocation5 + $0x388] ss:$16 sps:$4 sm:$0xff]  }
  0xbb   :  { %1791 = vmatpush2.bf16.msra.mxu0 %v3269_v16  ;;  %v3355_v16 = vld [vmem:[#allocation5 + $0x16c] ss:$16 sps:$4 sm:$0xff]  }
  0xbc   :  { %1834 = vmatpush2.bf16.msra.mxu1 %v3272_v17  ;;  %1792 = vmatprep.subr.bf16.mxu0 %v3277_v18  ;;  %v3358_v17 = vld [vmem:[#allocation5 + $0x36c] ss:$16 sps:$4 sm:$0xff]   ;;  %v3353_v18 = vld [vmem:[#allocation5 + $0x168] ss:$16 sps:$4 sm:$0xff]  }
  0xbd   :  { %1835 = vmatprep.subr.bf16.mxu1 %v3280_v19  ;;  %v3356_v19 = vld [vmem:[#allocation5 + $0x368] ss:$16 sps:$4 sm:$0xff]  }
  0xbf   :  { %1793 = vmatpush2.bf16.msra.mxu0 %v3275_v20  ;;  %v3361_v20 = vld [vmem:[#allocation5 + $0x14c] ss:$16 sps:$4 sm:$0xff]  }
  0xc0   :  { %1836 = vmatpush2.bf16.msra.mxu1 %v3278_v21  ;;  %1848 = vmatprep.subr.bf16.mxu0 %v3283_v26  ;;  %v3364_v21 = vld [vmem:[#allocation5 + $0x34c] ss:$16 sps:$4 sm:$0xff]   ;;  %v3365_v26 = vld [vmem:[#allocation5 + $0x128] ss:$16 sps:$4 sm:$0xff]  }
  0xc1   :  { %1891 = vmatprep.subr.bf16.mxu1 %v3286_v27  ;;  %v3368_v27 = vld [vmem:[#allocation5 + $0x328] ss:$16 sps:$4 sm:$0xff]  }
  0xc2   :  { %1795 = vmatmul.mubr.bf16.vlgmr.msra.gmra.mxu0 %v3802_v28 }
  0xc3   :  { %1838 = vmatmul.mubr.bf16.vlgmr.msra.gmra.mxu1 %v3804_v29  ;;  %1849 = vmatpush1.bf16.msra.mxu0 %v3281_v30  ;;  %v3373_v30 = vld [vmem:[#allocation5 + $0x10c] ss:$16 sps:$4 sm:$0xff]  }
  0xc4   :  { %1892 = vmatpush1.bf16.msra.mxu1 %v3284_v31  ;;  %1850 = vmatprep.subr.bf16.mxu0 %v3289_v32  ;;  %v3376_v31 = vld [vmem:[#allocation5 + $0x30c] ss:$16 sps:$4 sm:$0xff]   ;;  %v3371_v32 = vld [vmem:[#allocation5 + $0x108] ss:$16 sps:$4 sm:$0xff]  }
  0xc5   :  { %1893 = vmatprep.subr.bf16.mxu1 %v3292_v33  ;;  %1880 = vmatprep.mubr.bf16.mxu0 %v3784_v53  ;;  %v3308_v53 = vld [vmem:[#allocation5 + $0x268] ss:$16 sps:$4 sm:$0xff]  }
  0xc6   :  { %1923 = vmatprep.mubr.bf16.mxu1 %v3786_v54  ;;  %v3313_v54 = vld [vmem:[#allocation5 + $0x4c] ss:$16 sps:$4 sm:$0xff]   ;;  %v3374_v33 = vld [vmem:[#allocation5 + $0x308] ss:$16 sps:$4 sm:$0xff]  }
  0xc7   :  { %1851 = vmatpush1.bf16.msra.mxu0 %v3287_v34  ;;  %v3379_v34 = vld [vmem:[#allocation5 + $0x4ec] ss:$16 sps:$4 sm:$0xff]  }
  0xc8   :  { %1894 = vmatpush1.bf16.msra.mxu1 %v3290_v35  ;;  %1852 = vmatprep.subr.bf16.mxu0 %v3295_v36  ;;  %v3382_v35 = vld [vmem:[#allocation5 + $0x6ec] ss:$16 sps:$4 sm:$0xff]   ;;  %v3377_v36 = vld [vmem:[#allocation5 + $0x4e8] ss:$16 sps:$4 sm:$0xff]  }
  0xc9   :  { %1895 = vmatprep.subr.bf16.mxu1 %v3298_v37  ;;  %v3380_v37 = vld [vmem:[#allocation5 + $0x6e8] ss:$16 sps:$4 sm:$0xff]  }
  0xcb   :  { %1853 = vmatpush1.bf16.msra.mxu0 %v3293_v38  ;;  %v3385_v38 = vld [vmem:[#allocation5 + $0x4cc] ss:$16 sps:$4 sm:$0xff]  }
  0xcc   :  { %1896 = vmatpush1.bf16.msra.mxu1 %v3296_v39  ;;  %1854 = vmatprep.subr.bf16.mxu0 %v3301_v40  ;;  %v3388_v39 = vld [vmem:[#allocation5 + $0x6cc] ss:$16 sps:$4 sm:$0xff]   ;;  %v3383_v40 = vld [vmem:[#allocation5 + $0x4c8] ss:$16 sps:$4 sm:$0xff]  }
  0xcd   :  { %1897 = vmatprep.subr.bf16.mxu1 %v3304_v41  ;;  %v3386_v41 = vld [vmem:[#allocation5 + $0x6c8] ss:$16 sps:$4 sm:$0xff]  }
  0xcf   :  { %1855 = vmatpush1.bf16.msra.mxu0 %v3299_v42  ;;  %v3391_v42 = vld [vmem:[#allocation5 + $0x4ac] ss:$16 sps:$4 sm:$0xff]  }
  0xd0   :  { %1898 = vmatpush1.bf16.msra.mxu1 %v3302_v43  ;;  %1856 = vmatprep.subr.bf16.mxu0 %v3307_v44  ;;  %v3394_v43 = vld [vmem:[#allocation5 + $0x6ac] ss:$16 sps:$4 sm:$0xff]   ;;  %v3389_v44 = vld [vmem:[#allocation5 + $0x4a8] ss:$16 sps:$4 sm:$0xff]  }
  0xd1   :  { %1899 = vmatprep.subr.bf16.mxu1 %v3310_v46  ;;  %v3392_v46 = vld [vmem:[#allocation5 + $0x6a8] ss:$16 sps:$4 sm:$0xff]  }
  0xd3   :  { %1857 = vmatpush1.bf16.msra.mxu0 %v3305_v48  ;;  %v3397_v48 = vld [vmem:[#allocation5 + $0x48c] ss:$16 sps:$4 sm:$0xff]  }
  0xd4   :  { %1900 = vmatpush1.bf16.msra.mxu1 %v3308_v53  ;;  %1858 = vmatprep.subr.bf16.mxu0 %v3313_v54  ;;  %v3395_v53 = vld [vmem:[#allocation5 + $0x488] ss:$16 sps:$4 sm:$0xff]   ;;  %v3403_v54 = vld [vmem:[#allocation5 + $0x46c] ss:$16 sps:$4 sm:$0xff]  }
  0xd5   :  { %1901 = vmatprep.subr.bf16.mxu1 %v3316_v49  ;;  %v3406_v49 = vld [vmem:[#allocation5 + $0x66c] ss:$16 sps:$4 sm:$0xff]  }
  0xd7   :  { %1859 = vmatpush1.bf16.msra.mxu0 %v3311_v50  ;;  %v3401_v50 = vld [vmem:[#allocation5 + $0x468] ss:$16 sps:$4 sm:$0xff]  }
  0xd8   :  { %1902 = vmatpush1.bf16.msra.mxu1 %v3314_v51  ;;  %1860 = vmatprep.subr.bf16.mxu0 %v3319_v52  ;;  %v3404_v51 = vld [vmem:[#allocation5 + $0x668] ss:$16 sps:$4 sm:$0xff]   ;;  %v3409_v52 = vld [vmem:[#allocation5 + $0x44c] ss:$16 sps:$4 sm:$0xff]  }
  0xd9   :  { %1903 = vmatprep.subr.bf16.mxu1 %v3322_v55  ;;  %v3410_v55 = vld [vmem:[#allocation5 + $0x648] ss:$16 sps:$4 sm:$0xff]  }
  0xdb   :  { %1861 = vmatpush1.bf16.msra.mxu0 %v3317_v56  ;;  %v3415_v56 = vld [vmem:[#allocation5 + $0x42c] ss:$16 sps:$4 sm:$0xff]  }
  0xdc   :  { %1904 = vmatpush1.bf16.msra.mxu1 %v3320_v57  ;;  %1862 = vmatprep.subr.bf16.mxu0 %v3325_v58  ;;  %v3418_v57 = vld [vmem:[#allocation5 + $0x62c] ss:$16 sps:$4 sm:$0xff]   ;;  %v3413_v58 = vld [vmem:[#allocation5 + $0x428] ss:$16 sps:$4 sm:$0xff]  }
  0xdd   :  { %1905 = vmatprep.subr.bf16.mxu1 %v3328_v59  ;;  %v3416_v59 = vld [vmem:[#allocation5 + $0x628] ss:$16 sps:$4 sm:$0xff]  }
  0xdf   :  { %1863 = vmatpush1.bf16.msra.mxu0 %v3323_v60  ;;  %v3421_v60 = vld [vmem:[#allocation5 + $0x40c] ss:$16 sps:$4 sm:$0xff]  }
  0xe0   :  { %1906 = vmatpush1.bf16.msra.mxu1 %v3326_v61  ;;  %1864 = vmatprep.subr.bf16.mxu0 %v3331_v62  ;;  %v3424_v61 = vld [vmem:[#allocation5 + $0x60c] ss:$16 sps:$4 sm:$0xff]   ;;  %v3419_v62 = vld [vmem:[#allocation5 + $0x408] ss:$16 sps:$4 sm:$0xff]  }
  0xe1   :  { %1907 = vmatprep.subr.bf16.mxu1 %v3334_v63  ;;  %v3422_v63 = vld [vmem:[#allocation5 + $0x608] ss:$16 sps:$4 sm:$0xff]  }
  0xe3   :  { %1865 = vmatpush2.bf16.msra.mxu0 %v3329_v0  ;;  %v3427_v0 = vld [vmem:[#allocation5 + $0x5ec] ss:$16 sps:$4 sm:$0xff]  }
  0xe4   :  { %1908 = vmatpush2.bf16.msra.mxu1 %v3332_v1  ;;  %1866 = vmatprep.subr.bf16.mxu0 %v3337_v2  ;;  %v3430_v1 = vld [vmem:[#allocation5 + $0x7ec] ss:$16 sps:$4 sm:$0xff]   ;;  %v3425_v2 = vld [vmem:[#allocation5 + $0x5e8] ss:$16 sps:$4 sm:$0xff]  }
  0xe5   :  { %1909 = vmatprep.subr.bf16.mxu1 %v3340_v3  ;;  %v3428_v3 = vld [vmem:[#allocation5 + $0x7e8] ss:$16 sps:$4 sm:$0xff]  }
  0xe7   :  { %1867 = vmatpush2.bf16.msra.mxu0 %v3335_v4  ;;  %v3433_v4 = vld [vmem:[#allocation5 + $0x5cc] ss:$16 sps:$4 sm:$0xff]  }
  0xe8   :  { %1910 = vmatpush2.bf16.msra.mxu1 %v3338_v5  ;;  %1868 = vmatprep.subr.bf16.mxu0 %v3343_v6  ;;  %v3436_v5 = vld [vmem:[#allocation5 + $0x7cc] ss:$16 sps:$4 sm:$0xff]   ;;  %v3431_v6 = vld [vmem:[#allocation5 + $0x5c8] ss:$16 sps:$4 sm:$0xff]  }
  0xe9   :  { %1911 = vmatprep.subr.bf16.mxu1 %v3346_v7  ;;  %v3434_v7 = vld [vmem:[#allocation5 + $0x7c8] ss:$16 sps:$4 sm:$0xff]  }
  0xeb   :  { %1869 = vmatpush2.bf16.msra.mxu0 %v3341_v8  ;;  %v3439_v8 = vld [vmem:[#allocation5 + $0x5ac] ss:$16 sps:$4 sm:$0xff]  }
  0xec   :  { %1912 = vmatpush2.bf16.msra.mxu1 %v3344_v9  ;;  %1870 = vmatprep.subr.bf16.mxu0 %v3349_v10  ;;  %v3442_v9 = vld [vmem:[#allocation5 + $0x7ac] ss:$16 sps:$4 sm:$0xff]   ;;  %v3437_v10 = vld [vmem:[#allocation5 + $0x5a8] ss:$16 sps:$4 sm:$0xff]  }
  0xed   :  { %1913 = vmatprep.subr.bf16.mxu1 %v3352_v11  ;;  %v3440_v11 = vld [vmem:[#allocation5 + $0x7a8] ss:$16 sps:$4 sm:$0xff]  }
  0xef   :  { %1871 = vmatpush2.bf16.msra.mxu0 %v3347_v14  ;;  %v3445_v14 = vld [vmem:[#allocation5 + $0x58c] ss:$16 sps:$4 sm:$0xff]  }
  0xf0   :  { %1914 = vmatpush2.bf16.msra.mxu1 %v3350_v15  ;;  %1872 = vmatprep.subr.bf16.mxu0 %v3355_v16  ;;  %v3448_v15 = vld [vmem:[#allocation5 + $0x78c] ss:$16 sps:$4 sm:$0xff]   ;;  %v3443_v16 = vld [vmem:[#allocation5 + $0x588] ss:$16 sps:$4 sm:$0xff]  }
  0xf1   :  { %1915 = vmatprep.subr.bf16.mxu1 %v3358_v17  ;;  %v3446_v17 = vld [vmem:[#allocation5 + $0x788] ss:$16 sps:$4 sm:$0xff]  }
  0xf3   :  { %1873 = vmatpush2.bf16.msra.mxu0 %v3353_v18  ;;  %v3451_v18 = vld [vmem:[#allocation5 + $0x56c] ss:$16 sps:$4 sm:$0xff]  }
  0xf4   :  { %1916 = vmatpush2.bf16.msra.mxu1 %v3356_v19  ;;  %1874 = vmatprep.subr.bf16.mxu0 %v3361_v20  ;;  %v3454_v19 = vld [vmem:[#allocation5 + $0x76c] ss:$16 sps:$4 sm:$0xff]   ;;  %v3449_v20 = vld [vmem:[#allocation5 + $0x568] ss:$16 sps:$4 sm:$0xff]  }
  0xf5   :  { %1917 = vmatprep.subr.bf16.mxu1 %v3364_v21  ;;  %v3452_v21 = vld [vmem:[#allocation5 + $0x768] ss:$16 sps:$4 sm:$0xff]  }
  0xf7   :  { %1875 = vmatpush2.bf16.msra.mxu0 %v3359_v22  ;;  %v3457_v22 = vld [vmem:[#allocation5 + $0x54c] ss:$16 sps:$4 sm:$0xff]  }
  0xf8   :  { %1918 = vmatpush2.bf16.msra.mxu1 %v3362_v23  ;;  %1876 = vmatprep.subr.bf16.mxu0 %v3367_v24  ;;  %v3460_v23 = vld [vmem:[#allocation5 + $0x74c] ss:$16 sps:$4 sm:$0xff]   ;;  %v3455_v24 = vld [vmem:[#allocation5 + $0x548] ss:$16 sps:$4 sm:$0xff]  }
  0xf9   :  { %1919 = vmatprep.subr.bf16.mxu1 %v3370_v25  ;;  %v3458_v25 = vld [vmem:[#allocation5 + $0x748] ss:$16 sps:$4 sm:$0xff]  }
  0xfb   :  { %1877 = vmatpush2.bf16.msra.mxu0 %v3365_v26  ;;  %v3463_v26 = vld [vmem:[#allocation5 + $0x52c] ss:$16 sps:$4 sm:$0xff]  }
  0xfc   :  { %1920 = vmatpush2.bf16.msra.mxu1 %v3368_v27  ;;  %1878 = vmatprep.subr.bf16.mxu0 %v3373_v30  ;;  %v3466_v27 = vld [vmem:[#allocation5 + $0x72c] ss:$16 sps:$4 sm:$0xff]   ;;  %v3461_v30 = vld [vmem:[#allocation5 + $0x528] ss:$16 sps:$4 sm:$0xff]  }
  0xfd   :  { %1921 = vmatprep.subr.bf16.mxu1 %v3376_v31  ;;  %v3464_v31 = vld [vmem:[#allocation5 + $0x728] ss:$16 sps:$4 sm:$0xff]  }
  0xff   :  { %1879 = vmatpush2.bf16.msra.mxu0 %v3371_v32  ;;  %v3469_v32 = vld [vmem:[#allocation5 + $0x50c] ss:$16 sps:$4 sm:$0xff]  }
 0x100   :  { %1922 = vmatpush2.bf16.msra.mxu1 %v3374_v33  ;;  %1934 = vmatprep.subr.bf16.mxu0 %v3379_v34  ;;  %v3472_v33 = vld [vmem:[#allocation5 + $0x70c] ss:$16 sps:$4 sm:$0xff]   ;;  %v3467_v34 = vld [vmem:[#allocation5 + $0x508] ss:$16 sps:$4 sm:$0xff]  }
 0x101   :  { %1977 = vmatprep.subr.bf16.mxu1 %v3382_v35  ;;  %v3470_v35 = vld [vmem:[#allocation5 + $0x708] ss:$16 sps:$4 sm:$0xff]  }
 0x102   :  { %1881 = vmatmul.mubr.bf16.vlgmr.msra.gmra.mxu0 %v3790_v12  ;;  %v3400_v12 = vld [vmem:[#allocation5 + $0x68c] ss:$16 sps:$4 sm:$0xff]  }
 0x103   :  { %1924 = vmatmul.mubr.bf16.vlgmr.msra.gmra.mxu1 %v3792_v13  ;;  %1935 = vmatpush1.bf16.msra.mxu0 %v3377_v36  ;;  %v3398_v13 = vld [vmem:[#allocation5 + $0x688] ss:$16 sps:$4 sm:$0xff]  }
 0x104   :  { %1978 = vmatpush1.bf16.msra.mxu1 %v3380_v37  ;;  %1936 = vmatprep.subr.bf16.mxu0 %v3385_v38  ;;  %v3475_v36 = vld [vmem:[#allocation8 + $0x74] ss:$8 sps:$4 sm:$0xff]   ;;  %v3473_v37 = vld [vmem:[#allocation8 + $0x70] ss:$8 sps:$4 sm:$0xff]   ;;  %v3478_v38 = vld [vmem:[#allocation8 + $0x64] ss:$8 sps:$4 sm:$0xff]  }
 0x105   :  { %1979 = vmatprep.subr.bf16.mxu1 %v3388_v39  ;;  %1966 = vmatprep.mubr.bf16.mxu0 %v3796_v45  ;;  %v3412_v45 = vld [vmem:[#allocation5 + $0x64c] ss:$16 sps:$4 sm:$0xff]  }
 0x106   :  { %2009 = vmatprep.mubr.bf16.mxu1 %v3798_v47  ;;  %v3407_v47 = vld [vmem:[#allocation5 + $0x448] ss:$16 sps:$4 sm:$0xff]   ;;  %v3476_v39 = vld [vmem:[#allocation8 + $0x60] ss:$8 sps:$4 sm:$0xff]  }
 0x107   :  { %1937 = vmatpush1.bf16.msra.mxu0 %v3383_v40  ;;  %v3481_v40 = vld [vmem:[#allocation8 + $0x54] ss:$8 sps:$4 sm:$0xff]  }
 0x108   :  { %1980 = vmatpush1.bf16.msra.mxu1 %v3386_v41  ;;  %1938 = vmatprep.subr.bf16.mxu0 %v3391_v42  ;;  %v3479_v41 = vld [vmem:[#allocation8 + $0x50] ss:$8 sps:$4 sm:$0xff]   ;;  %v3484_v42 = vld [vmem:[#allocation8 + $0x44] ss:$8 sps:$4 sm:$0xff]  }
 0x109   :  { %1981 = vmatprep.subr.bf16.mxu1 %v3394_v43  ;;  %v3482_v43 = vld [vmem:[#allocation8 + $0x40] ss:$8 sps:$4 sm:$0xff]  }
 0x10b   :  { %1939 = vmatpush1.bf16.msra.mxu0 %v3389_v44  ;;  %v3521_v44 = vld [vmem:[#allocation8 + $0x170] ss:$8 sps:$4 sm:$0xff]  }
 0x10c   :  { %1982 = vmatpush1.bf16.msra.mxu1 %v3392_v46  ;;  %1940 = vmatprep.subr.bf16.mxu0 %v3397_v48  ;;  %v3523_v46 = vld [vmem:[#allocation8 + $0x174] ss:$8 sps:$4 sm:$0xff]  }
 0x10d   :  { %1983 = vmatprep.subr.bf16.mxu1 %v3400_v12  ;;  %v3487_v48 = vld [vmem:[#allocation8 + $0x34] ss:$8 sps:$4 sm:$0xff]   ;;  %v3526_v12 = vld [vmem:[#allocation8 + $0x164] ss:$8 sps:$4 sm:$0xff]  }
 0x10f   :  { %1941 = vmatpush1.bf16.msra.mxu0 %v3395_v53  ;;  %v3529_v53 = vld [vmem:[#allocation8 + $0x154] ss:$8 sps:$4 sm:$0xff]  }
 0x110   :  { %1984 = vmatpush1.bf16.msra.mxu1 %v3398_v13  ;;  %1942 = vmatprep.subr.bf16.mxu0 %v3403_v54  ;;  %v3490_v13 = vld [vmem:[#allocation8 + $0x24] ss:$8 sps:$4 sm:$0xff]   ;;  %v3527_v54 = vld [vmem:[#allocation8 + $0x150] ss:$8 sps:$4 sm:$0xff]  }
 0x111   :  { %1985 = vmatprep.subr.bf16.mxu1 %v3406_v49  ;;  %v3488_v49 = vld [vmem:[#allocation8 + $0x20] ss:$8 sps:$4 sm:$0xff]  }
 0x113   :  { %1943 = vmatpush1.bf16.msra.mxu0 %v3401_v50  ;;  %v3532_v50 = vld [vmem:[#allocation8 + $0x144] ss:$8 sps:$4 sm:$0xff]  }
 0x114   :  { %1986 = vmatpush1.bf16.msra.mxu1 %v3404_v51  ;;  %1944 = vmatprep.subr.bf16.mxu0 %v3409_v52  ;;  %v3493_v51 = vld [vmem:[#allocation8 + $0x14] ss:$8 sps:$4 sm:$0xff]   ;;  %v3530_v52 = vld [vmem:[#allocation8 + $0x140] ss:$8 sps:$4 sm:$0xff]  }
 0x115   :  { %1987 = vmatprep.subr.bf16.mxu1 %v3412_v45  ;;  %v3491_v45 = vld [vmem:[#allocation8 + $0x10] ss:$8 sps:$4 sm:$0xff]  }
 0x117   :  { %1945 = vmatpush1.bf16.msra.mxu0 %v3407_v47  ;;  %v3535_v47 = vld [vmem:[#allocation8 + $0x134] ss:$8 sps:$4 sm:$0xff]  }
 0x118   :  { %1988 = vmatpush1.bf16.msra.mxu1 %v3410_v55  ;;  %1946 = vmatprep.subr.bf16.mxu0 %v3415_v56  ;;  %v3496_v55 = vld [vmem:[#allocation8 + $0x4] ss:$8 sps:$4 sm:$0xff]   ;;  %v3533_v56 = vld [vmem:[#allocation8 + $0x130] ss:$8 sps:$4 sm:$0xff]  }
 0x119   :  { %1989 = vmatprep.subr.bf16.mxu1 %v3418_v57  ;;  %v3494_v57 = vld [vmem:[#allocation8] ss:$8 sps:$4 sm:$0xff]  }
 0x11b   :  { %1947 = vmatpush1.bf16.msra.mxu0 %v3413_v58  ;;  %v3538_v58 = vld [vmem:[#allocation8 + $0x124] ss:$8 sps:$4 sm:$0xff]  }
 0x11c   :  { %1990 = vmatpush1.bf16.msra.mxu1 %v3416_v59  ;;  %1948 = vmatprep.subr.bf16.mxu0 %v3421_v60  ;;  %v3499_v59 = vld [vmem:[#allocation8 + $0xf4] ss:$8 sps:$4 sm:$0xff]   ;;  %v3536_v60 = vld [vmem:[#allocation8 + $0x120] ss:$8 sps:$4 sm:$0xff]  }
 0x11d   :  { %1991 = vmatprep.subr.bf16.mxu1 %v3424_v61  ;;  %v3497_v61 = vld [vmem:[#allocation8 + $0xf0] ss:$8 sps:$4 sm:$0xff]  }
 0x11f   :  { %1949 = vmatpush1.bf16.msra.mxu0 %v3419_v62  ;;  %v3541_v62 = vld [vmem:[#allocation8 + $0x114] ss:$8 sps:$4 sm:$0xff]  }
 0x120   :  { %1992 = vmatpush1.bf16.msra.mxu1 %v3422_v63  ;;  %1950 = vmatprep.subr.bf16.mxu0 %v3427_v0  ;;  %v3502_v63 = vld [vmem:[#allocation8 + $0xe4] ss:$8 sps:$4 sm:$0xff]   ;;  %v3539_v0 = vld [vmem:[#allocation8 + $0x110] ss:$8 sps:$4 sm:$0xff]  }
 0x121   :  { %1993 = vmatprep.subr.bf16.mxu1 %v3430_v1  ;;  %v3500_v1 = vld [vmem:[#allocation8 + $0xe0] ss:$8 sps:$4 sm:$0xff]  }
 0x123   :  { %1951 = vmatpush2.bf16.msra.mxu0 %v3425_v2  ;;  %v3544_v2 = vld [vmem:[#allocation8 + $0x104] ss:$8 sps:$4 sm:$0xff]  }
 0x124   :  { %1994 = vmatpush2.bf16.msra.mxu1 %v3428_v3  ;;  %1952 = vmatprep.subr.bf16.mxu0 %v3433_v4  ;;  %v3505_v3 = vld [vmem:[#allocation8 + $0xd4] ss:$8 sps:$4 sm:$0xff]   ;;  %v3542_v4 = vld [vmem:[#allocation8 + $0x100] ss:$8 sps:$4 sm:$0xff]  }
 0x125   :  { %1995 = vmatprep.subr.bf16.mxu1 %v3436_v5  ;;  %v3503_v5 = vld [vmem:[#allocation8 + $0xd0] ss:$8 sps:$4 sm:$0xff]  }
 0x127   :  { %1953 = vmatpush2.bf16.msra.mxu0 %v3431_v6  ;;  %v3547_v6 = vld [vmem:[#allocation8 + $0x1f4] ss:$8 sps:$4 sm:$0xff]  }
 0x128   :  { %1996 = vmatpush2.bf16.msra.mxu1 %v3434_v7  ;;  %1954 = vmatprep.subr.bf16.mxu0 %v3439_v8  ;;  %v3508_v7 = vld [vmem:[#allocation8 + $0xc4] ss:$8 sps:$4 sm:$0xff]   ;;  %v3545_v8 = vld [vmem:[#allocation8 + $0x1f0] ss:$8 sps:$4 sm:$0xff]  }
 0x129   :  { %1997 = vmatprep.subr.bf16.mxu1 %v3442_v9  ;;  %v3506_v9 = vld [vmem:[#allocation8 + $0xc0] ss:$8 sps:$4 sm:$0xff]  }
 0x12b   :  { %1955 = vmatpush2.bf16.msra.mxu0 %v3437_v10  ;;  %v3550_v10 = vld [vmem:[#allocation8 + $0x1e4] ss:$8 sps:$4 sm:$0xff]  }
 0x12c   :  { %1998 = vmatpush2.bf16.msra.mxu1 %v3440_v11  ;;  %1956 = vmatprep.subr.bf16.mxu0 %v3445_v14  ;;  %v3511_v11 = vld [vmem:[#allocation8 + $0xb4] ss:$8 sps:$4 sm:$0xff]   ;;  %v3548_v14 = vld [vmem:[#allocation8 + $0x1e0] ss:$8 sps:$4 sm:$0xff]  }
 0x12d   :  { %1999 = vmatprep.subr.bf16.mxu1 %v3448_v15  ;;  %v376_v15 = vlaneseq }
 0x12f   :  { %1957 = vmatpush2.bf16.msra.mxu0 %v3443_v16  ;;  %v3509_v16 = vld [vmem:[#allocation8 + $0xb0] ss:$8 sps:$4 sm:$0xff]  }
 0x130   :  { %2000 = vmatpush2.bf16.msra.mxu1 %v3446_v17  ;;  %1958 = vmatprep.subr.bf16.mxu0 %v3451_v18  ;;  %v3553_v17 = vld [vmem:[#allocation8 + $0x1d4] ss:$8 sps:$4 sm:$0xff]   ;;  %v3514_v18 = vld [vmem:[#allocation8 + $0xa4] ss:$8 sps:$4 sm:$0xff]  }
 0x131   :  { %2001 = vmatprep.subr.bf16.mxu1 %v3454_v19  ;;  %v3551_v19 = vld [vmem:[#allocation8 + $0x1d0] ss:$8 sps:$4 sm:$0xff]  }
 0x133   :  { %1959 = vmatpush2.bf16.msra.mxu0 %v3449_v20  ;;  %v3816_v20 = vshrl.u32 %v376_v15, 7  ;;  %v3569_v15 = vld [vmem:[#allocation10 + $0x78] sm:$0xff]  }
 0x134   :  { %2002 = vmatpush2.bf16.msra.mxu1 %v3452_v21  ;;  %1960 = vmatprep.subr.bf16.mxu0 %v3457_v22  ;;  %v3512_v21 = vld [vmem:[#allocation8 + $0xa0] ss:$8 sps:$4 sm:$0xff]   ;;  %v3556_v22 = vld [vmem:[#allocation8 + $0x1c4] ss:$8 sps:$4 sm:$0xff]  }
 0x135   :  { %2003 = vmatprep.subr.bf16.mxu1 %v3460_v23 }
 0x137   :  { %1961 = vmatpush2.bf16.msra.mxu0 %v3455_v24 }
 0x138   :  { %2004 = vmatpush2.bf16.msra.mxu1 %v3458_v25  ;;  %1962 = vmatprep.subr.bf16.mxu0 %v3463_v26  ;;  %v3517_v25 = vld [vmem:[#allocation8 + $0x94] ss:$8 sps:$4 sm:$0xff]   ;;  %v3554_v26 = vld [vmem:[#allocation8 + $0x1c0] ss:$8 sps:$4 sm:$0xff]  }
 0x139   :  { %2005 = vmatprep.subr.bf16.mxu1 %v3466_v27  ;;  %v382_v27 = vsub.s32 1, %v3816_v20 }
 0x13b   :  { %1963 = vmatpush2.bf16.msra.mxu0 %v3461_v30  ;;  %v3515_v30 = vld [vmem:[#allocation8 + $0x90] ss:$8 sps:$4 sm:$0xff]  }
 0x13c   :  { %2006 = vmatpush2.bf16.msra.mxu1 %v3464_v31  ;;  %1964 = vmatprep.subr.bf16.mxu0 %v3469_v32  ;;  %v3819_v31 = vld [vmem:[#allocation7] sm:$0xf]  ;;  %v378_v32 = vsub.s32 0, %v3816_v20 }
 0x13d   :  { %2007 = vmatprep.subr.bf16.mxu1 %v3472_v33 }
 0x13f   :  { %1965 = vmatpush2.bf16.msra.mxu0 %v3467_v34 }
 0x140   :  { %2008 = vmatpush2.bf16.msra.mxu1 %v3470_v35  ;;  %2428 = vmatprep.subr.bf16.mxu0 %v3475_v36  ;;  %v3520_v35 = vld [vmem:[#allocation8 + $0x84] ss:$8 sps:$4 sm:$0xff]   ;;  %v383_v36 = vrot.slane %v3819_v31, %v382_v27 }
 0x141   :  { %2471 = vmatprep.subr.bf16.mxu1 %v3523_v46  ;;  %v3559_v46 = vld [vmem:[#allocation8 + $0x1b4] ss:$8 sps:$4 sm:$0xff]  }
 0x142   :  { %1967 = vmatmul.mubr.bf16.vlgmr.msra.gmra.mxu0 %v3802_v28  ;;  %v3524_v28 = vld [vmem:[#allocation8 + $0x160] ss:$8 sps:$4 sm:$0xff]   ;;  %v1710_v23 = vpop.f32.mrf.mxu0 }
 0x143   :  { %2010 = vmatmul.mubr.bf16.vlgmr.msra.gmra.mxu1 %v3804_v29  ;;  %2429 = vmatpush1.bf16.msra.mxu0 %v3473_v37  ;;  %v3485_v29 = vld [vmem:[#allocation8 + $0x30] ss:$8 sps:$4 sm:$0xff]   ;;  %v1753_v24 = vpop.f32.mrf.mxu1  ;;  %v3518_v37 = vld [vmem:[#allocation8 + $0x80] ss:$8 sps:$4 sm:$0xff]  }
 0x144   :  { %2430 = vmatprep.subr.bf16.mxu0 %v3478_v38  ;;  %2472 = vmatpush1.bf16.msra.mxu1 %v3521_v44  ;;  %v1712_v33 = vpop.f32.mrf.mxu0  ;;  %v379_v38 = vrot.slane %v3819_v31, %v378_v32 }
 0x145   :  { %2473 = vmatprep.subr.bf16.mxu1 %v3526_v12  ;;  %v1755_v34 = vpop.f32.mrf.mxu1  ;;  %v3557_v12 = vld [vmem:[#allocation8 + $0x1b0] ss:$8 sps:$4 sm:$0xff]  }
 0x147   :  { %2431 = vmatpush1.bf16.msra.mxu0 %v3476_v39  ;;  %v1714_v39 = vpop.f32.mrf.mxu0 }
 0x148   :  { %2432 = vmatprep.subr.bf16.mxu0 %v3481_v40  ;;  %2474 = vmatpush1.bf16.msra.mxu1 %v3524_v28  ;;  %v1757_v40 = vpop.f32.mrf.mxu1 }
 0x149   :  { %2475 = vmatprep.subr.bf16.mxu1 %v3529_v53 }
 0x14a   :  { %v1759_v44 = vpop.f32.mrf.mxu1 }
 0x14b   :  { %2433 = vmatpush1.bf16.msra.mxu0 %v3479_v41  ;;  %v1713_v41 = vadd.f32 %v1712_v33, %v383_v36  ;;  %v390_v33 = vsub.s32 3, %v3816_v20 }
 0x14c   :  { %2434 = vmatprep.subr.bf16.mxu0 %v3484_v42  ;;  %2476 = vmatpush1.bf16.msra.mxu1 %v3527_v54  ;;  %v1711_v42 = vadd.f32 %v1710_v23, %v379_v38  ;;  %v3576_v23 = vld [vmem:[#allocation10 + $0x20] sm:$0xff]  }
 0x14d   :  { %2477 = vmatprep.subr.bf16.mxu1 %v3532_v50  ;;  %v1756_v53 = vadd.f32 %v1755_v34, %v1713_v41  ;;  %v386_v34 = vsub.s32 2, %v3816_v20 }
 0x14e   :  { %v1754_v54 = vadd.f32 %v1753_v24, %v1711_v42  ;;  %v3577_v24 = vld [vmem:[#allocation10 + $0x58] sm:$0xff]  }
 0x14f   :  { %2435 = vmatpush1.bf16.msra.mxu0 %v3482_v43  ;;  %v1716_v43 = vpop.f32.mrf.mxu0 }
 0x150   :  { %2436 = vmatprep.subr.bf16.mxu0 %v3487_v48  ;;  %2478 = vmatpush1.bf16.msra.mxu1 %v3530_v52  ;;  %v1715_v48 = vadd.f32 %v1714_v39, %v379_v38  ;;  %v387_v38 = vrot.slane %v3819_v31, %v386_v34 }
 0x151   :  { %2479 = vmatprep.subr.bf16.mxu1 %v3535_v47  ;;  %v3560_v47 = vld [vmem:[#allocation8 + $0x1a0] ss:$8 sps:$4 sm:$0xff]  }
 0x152   :  { %v1758_v52 = vadd.f32 %v1757_v40, %v1715_v48 }
 0x153   :  { %2437 = vmatpush1.bf16.msra.mxu0 %v3485_v29 }
 0x154   :  { %2438 = vmatprep.subr.bf16.mxu0 %v3490_v13  ;;  %2480 = vmatpush1.bf16.msra.mxu1 %v3533_v56  ;;  %v1717_v13 = vadd.f32 %v1716_v43, %v383_v36 }
 0x155   :  { %2481 = vmatprep.subr.bf16.mxu1 %v3538_v58 }
 0x156   :  { %v1760_v58 = vadd.f32 %v1759_v44, %v1717_v13 }
 0x157   :  { %2439 = vmatpush1.bf16.msra.mxu0 %v3488_v49 }
 0x158   :  { %2440 = vmatprep.subr.bf16.mxu0 %v3493_v51  ;;  %2482 = vmatpush1.bf16.msra.mxu1 %v3536_v60  ;;  %v3562_v51 = vld [vmem:[#allocation8 + $0x1a4] ss:$8 sps:$4 sm:$0xff]  }
 0x159   :  { %2483 = vmatprep.subr.bf16.mxu1 %v3541_v62 }
 0x15b   :  { %2441 = vmatpush1.bf16.msra.mxu0 %v3491_v45 }
 0x15c   :  { %2442 = vmatprep.subr.bf16.mxu0 %v3496_v55  ;;  %2484 = vmatpush1.bf16.msra.mxu1 %v3539_v0 }
 0x15d   :  { %2485 = vmatprep.subr.bf16.mxu1 %v3544_v2 }
 0x15f   :  { %2443 = vmatpush1.bf16.msra.mxu0 %v3494_v57 }
 0x160   :  { %2444 = vmatprep.subr.bf16.mxu0 %v3499_v59  ;;  %2486 = vmatpush1.bf16.msra.mxu1 %v3542_v4 }
 0x161   :  { %2487 = vmatprep.subr.bf16.mxu1 %v3547_v6  ;;  %v3568_v6 = vld [vmem:[#allocation8 + $0x184] ss:$8 sps:$4 sm:$0xff]  }
 0x163   :  { %2445 = vmatpush2.bf16.msra.mxu0 %v3497_v61  ;;  %v3565_v61 = vld [vmem:[#allocation8 + $0x194] ss:$8 sps:$4 sm:$0xff]  }
 0x164   :  { %2446 = vmatprep.subr.bf16.mxu0 %v3502_v63  ;;  %2488 = vmatpush2.bf16.msra.mxu1 %v3545_v8 }
 0x165   :  { %2489 = vmatprep.subr.bf16.mxu1 %v3550_v10 }
 0x167   :  { %2447 = vmatpush2.bf16.msra.mxu0 %v3500_v1  ;;  %v3563_v1 = vld [vmem:[#allocation8 + $0x190] ss:$8 sps:$4 sm:$0xff]  }
 0x168   :  { %2448 = vmatprep.subr.bf16.mxu0 %v3505_v3  ;;  %2490 = vmatpush2.bf16.msra.mxu1 %v3548_v14 }
 0x169   :  { %2491 = vmatprep.subr.bf16.mxu1 %v3553_v17  ;;  %v3571_v17 = vld [vmem:[#allocation10 + $0x70] sm:$0xff]  }
 0x16b   :  { %2449 = vmatpush2.bf16.msra.mxu0 %v3503_v5 }
 0x16c   :  { %2450 = vmatprep.subr.bf16.mxu0 %v3508_v7  ;;  %2492 = vmatpush2.bf16.msra.mxu1 %v3551_v19  ;;  %v3573_v19 = vld [vmem:[#allocation10 + $0x68] sm:$0xff]  }
 0x16d   :  { %2493 = vmatprep.subr.bf16.mxu1 %v3556_v22  ;;  %v3575_v22 = vld [vmem:[#allocation10 + $0x60] sm:$0xff]  }
 0x16f   :  { %2451 = vmatpush2.bf16.msra.mxu0 %v3506_v9  ;;  %v3566_v9 = vld [vmem:[#allocation8 + $0x180] ss:$8 sps:$4 sm:$0xff]  }
 0x170   :  { %2452 = vmatprep.subr.bf16.mxu0 %v3511_v11  ;;  %2494 = vmatpush2.bf16.msra.mxu1 %v3554_v26 }
 0x171   :  { %2495 = vmatprep.subr.bf16.mxu1 %v3559_v46 }
 0x173   :  { %2453 = vmatpush2.bf16.msra.mxu0 %v3509_v16  ;;  %v3570_v16 = vld [vmem:[#allocation10 + $0x38] sm:$0xff]  }
 0x174   :  { %2454 = vmatprep.subr.bf16.mxu0 %v3514_v18  ;;  %2496 = vmatpush2.bf16.msra.mxu1 %v3557_v12  ;;  %v3572_v18 = vld [vmem:[#allocation10 + $0x30] sm:$0xff]  }
 0x175   :  { %2497 = vmatprep.subr.bf16.mxu1 %v3562_v51 }
 0x177   :  { %2455 = vmatpush2.bf16.msra.mxu0 %v3512_v21  ;;  %v3574_v21 = vld [vmem:[#allocation10 + $0x28] sm:$0xff]  }
 0x178   :  { %2456 = vmatprep.subr.bf16.mxu0 %v3517_v25  ;;  %2498 = vmatpush2.bf16.msra.mxu1 %v3560_v47  ;;  %v3578_v25 = vld [vmem:[#allocation10 + $0x18] sm:$0xff]  }
 0x179   :  { %2499 = vmatprep.subr.bf16.mxu1 %v3565_v61 }
 0x17b   :  { %2457 = vmatpush2.bf16.msra.mxu0 %v3515_v30 }
 0x17c   :  { %2458 = vmatprep.subr.bf16.mxu0 %v3520_v35  ;;  %2500 = vmatpush2.bf16.msra.mxu1 %v3563_v1 }
 0x17d   :  { %2501 = vmatprep.subr.bf16.mxu1 %v3568_v6  ;;  %v3581_v6 = vld [vmem:[#allocation10 + $0x48] sm:$0xff]  }
 0x17f   :  { %2459 = vmatpush2.bf16.msra.mxu0 %v3518_v37  ;;  %v391_v37 = vrot.slane %v3819_v31, %v390_v33 }
 0x180   :  { %2502 = vmatpush2.bf16.msra.mxu1 %v3566_v9  ;;  %3054 = vmatprep.subr.bf16.mxu0 %v3569_v15  ;;  %v3584_v9 = vld [vmem:[#allocation10] sm:$0xff]  }
 0x182   :  { %v1796_v28 = vpop.f32.mrf.mxu0 }
 0x183   :  { %v1839_v29 = vpop.f32.mrf.mxu1  ;;  %v1797_v55 = vadd.f32 %v1796_v28, %v1754_v54 }
 0x184   :  { %v1798_v49 = vpop.f32.mrf.mxu0 }
 0x185   :  { %v1841_v50 = vpop.f32.mrf.mxu1  ;;  %v1799_v45 = vadd.f32 %v1798_v49, %v1756_v53  ;;  %v1840_v2 = vadd.f32 %v1839_v29, %v1797_v55 }
 0x186   :  { %v1800_v56 = vpop.f32.mrf.mxu0 }
 0x187   :  { %v1843_v57 = vpop.f32.mrf.mxu1  ;;  %v1801_v59 = vadd.f32 %v1800_v56, %v1758_v52  ;;  %v1842_v62 = vadd.f32 %v1841_v50, %v1799_v45  ;;  %v2020_v10 = vmax.f32 %v1840_v2, 0.0 }
 0x188   :  { %v1802_v60 = vpop.f32.mrf.mxu0 }
 0x189   :  { %v1844_v63 = vadd.f32 %v1843_v57, %v1801_v59  ;;  %v1803_v0 = vadd.f32 %v1802_v60, %v1760_v58  ;;  %v1845_v3 = vpop.f32.mrf.mxu1  ;;  %v2021_v7 = vmax.f32 %v1842_v62, 0.0 }
 0x18b   :  { %v1846_v4 = vadd.f32 %v1845_v3, %v1803_v0  ;;  %v2024_v5 = vmax.f32 %v1844_v63, 0.0 }
 0x18d   :  { %v2025_v8 = vmax.f32 %v1846_v4, 0.0  ;;  %v2028_v14 = vpack.c.bf16 %v2024_v5, %v2020_v10  ;;  %v3579_v4 = vld [vmem:[#allocation10 + $0x50] sm:$0xff]  }
 0x18e   :  { %v3580_v5 = vld [vmem:[#allocation10 + $0x10] sm:$0xff]  }
 0x18f   :  { %v2029_v11 = vpack.c.bf16 %v2025_v8, %v2021_v7  ;;  %v3582_v7 = vld [vmem:[#allocation10 + $0x8] sm:$0xff]   ;;  %v3583_v8 = vld [vmem:[#allocation10 + $0x40] sm:$0xff]  }
 0x191   :  { %2460 = vmatprep.mubr.bf16.mxu0 %v2029_v11 }
 0x192   :  { %2461 = vmatmul.mubr.bf16.vlgmr.msra.gmra.mxu0 %v2028_v14  ;;  %v2096_v14 = vld [vmem:[%s3852_s4] sm:$0x3] }
 0x193   :  { %3055 = vmatpush3.bf16.msra.mxu0 %v3570_v16  ;;  %v2105_v16 = vrot.slane %v2096_v14, %v382_v27 }
 0x194   :  { %3056 = vmatprep.subr.bf16.mxu0 %v3571_v17  ;;  %v2101_v17 = vrot.slane %v2096_v14, %v378_v32 }
 0x197   :  { %3057 = vmatpush3.bf16.msra.mxu0 %v3572_v18 }
 0x198   :  { %3058 = vmatprep.subr.bf16.mxu0 %v3573_v19 }
 0x19b   :  { %3059 = vmatpush3.bf16.msra.mxu0 %v3574_v21 }
 0x19c   :  { %3060 = vmatprep.subr.bf16.mxu0 %v3575_v22 }
 0x19f   :  { %3061 = vmatpush3.bf16.msra.mxu0 %v3576_v23 }
 0x1a0   :  { %3062 = vmatprep.subr.bf16.mxu0 %v3577_v24 }
 0x1a3   :  { %3063 = vmatpush3.bf16.msra.mxu0 %v3578_v25 }
 0x1a4   :  { %3064 = vmatprep.subr.bf16.mxu0 %v3579_v4 }
 0x1a7   :  { %3065 = vmatpush3.bf16.msra.mxu0 %v3580_v5 }
 0x1a8   :  { %3066 = vmatprep.subr.bf16.mxu0 %v3581_v6 }
 0x1ab   :  { %3067 = vmatpush3.bf16.msra.mxu0 %v3582_v7 }
 0x1ac   :  { %3068 = vmatprep.subr.bf16.mxu0 %v3583_v8 }
 0x1af   :  { %3069 = vmatpush3.bf16.msra.mxu0 %v3584_v9 }
 0x1c2   :  { %v1882_v26 = vpop.f32.mrf.mxu0 }
 0x1c3   :  { %v1925_v30 = vpop.f32.mrf.mxu1  ;;  %v1883_v42 = vadd.f32 %v1882_v26, %v387_v38 }
 0x1c4   :  { %v1884_v35 = vpop.f32.mrf.mxu0 }
 0x1c5   :  { %v1927_v36 = vpop.f32.mrf.mxu1  ;;  %v1885_v41 = vadd.f32 %v1884_v35, %v391_v37  ;;  %v1926_v53 = vadd.f32 %v1925_v30, %v1883_v42 }
 0x1c6   :  { %v1886_v39 = vpop.f32.mrf.mxu0 }
 0x1c7   :  { %v1929_v40 = vpop.f32.mrf.mxu1  ;;  %v1887_v46 = vadd.f32 %v1886_v39, %v387_v38  ;;  %v1928_v28 = vadd.f32 %v1927_v36, %v1885_v41  ;;  %v3037_v41 = vld [vmem:[%s3854_s6] ss:$0 sm:$0xff] }
 0x1c8   :  { %v1888_v43 = vpop.f32.mrf.mxu0 }
 0x1c9   :  { %v1931_v44 = vpop.f32.mrf.mxu1  ;;  %v1889_v29 = vadd.f32 %v1888_v43, %v391_v37  ;;  %v1930_v49 = vadd.f32 %v1929_v40, %v1887_v46 }
 0x1cb   :  { %v1932_v31 = vadd.f32 %v1931_v44, %v1889_v29 }
 0x202   :  { %v1968_v48 = vpop.f32.mrf.mxu0 }
 0x203   :  { %v2011_v12 = vpop.f32.mrf.mxu1  ;;  %v1969_v51 = vadd.f32 %v1968_v48, %v1926_v53 }
 0x204   :  { %v1970_v13 = vpop.f32.mrf.mxu0 }
 0x205   :  { %v2013_v54 = vpop.f32.mrf.mxu1  ;;  %v1971_v50 = vadd.f32 %v1970_v13, %v1928_v28  ;;  %v2012_v59 = vadd.f32 %v2011_v12, %v1969_v51 }
 0x206   :  { %v1972_v52 = vpop.f32.mrf.mxu0 }
 0x207   :  { %v2015_v45 = vpop.f32.mrf.mxu1  ;;  %v1973_v47 = vadd.f32 %v1972_v52, %v1930_v49  ;;  %v2014_v56 = vadd.f32 %v2013_v54, %v1971_v50  ;;  %v2022_v1 = vmax.f32 %v2012_v59, 0.0 }
 0x208   :  { %v1974_v55 = vpop.f32.mrf.mxu0 }
 0x209   :  { %v2016_v57 = vadd.f32 %v2015_v45, %v1973_v47  ;;  %v1975_v58 = vadd.f32 %v1974_v55, %v1932_v31  ;;  %v2017_v60 = vpop.f32.mrf.mxu1  ;;  %v2023_v63 = vmax.f32 %v2014_v56, 0.0 }
 0x20b   :  { %v2018_v61 = vadd.f32 %v2017_v60, %v1975_v58  ;;  %v2026_v62 = vmax.f32 %v2016_v57, 0.0 }
 0x20d   :  { %v2027_v0 = vmax.f32 %v2018_v61, 0.0  ;;  %v2030_v3 = vpack.c.bf16 %v2026_v62, %v2022_v1 }
 0x20f   :  { %v2031_v2 = vpack.c.bf16 %v2027_v0, %v2023_v63 }
 0x211   :  { %2503 = vmatprep.mubr.bf16.mxu1 %v2031_v2 }
 0x212   :  { %2504 = vmatmul.mubr.bf16.vlgmr.msra.gmra.mxu1 %v2030_v3 }
 0x252   :  { %v2462_v10 = vpop.f32.mrf.mxu0 }
 0x253   :  { %v2463_v24 = vadd.f32 %v2462_v10, %v2101_v17 }
 0x254   :  { %v2464_v11 = vpop.f32.mrf.mxu0 }
 0x255   :  { %v2465_v22 = vadd.f32 %v2464_v11, %v2105_v16 }
 0x256   :  { %v2466_v15 = vpop.f32.mrf.mxu0 }
 0x257   :  { %v2467_v23 = vadd.f32 %v2466_v15, %v2101_v17 }
 0x258   :  { %v2468_v19 = vpop.f32.mrf.mxu0 }
 0x259   :  { %v2469_v26 = vadd.f32 %v2468_v19, %v2105_v16 }
 0x2d2   :  { %v2505_v18 = vpop.f32.mrf.mxu1 }
 0x2d3   :  { %v2506_v34 = vadd.f32 %v2505_v18, %v2463_v24 }
 0x2d4   :  { %v2507_v21 = vpop.f32.mrf.mxu1 }
 0x2d5   :  { %v2508_v30 = vadd.f32 %v2507_v21, %v2465_v22  ;;  %v2514_v27 = vmax.f32 %v2506_v34, 0.0 }
 0x2d6   :  { %v2509_v25 = vpop.f32.mrf.mxu1 }
 0x2d7   :  { %v2510_v33 = vadd.f32 %v2509_v25, %v2467_v23  ;;  %v2515_v38 = vmax.f32 %v2508_v30, 0.0 }
 0x2d8   :  { %v2511_v35 = vpop.f32.mrf.mxu1 }
 0x2d9   :  { %v2512_v36 = vadd.f32 %v2511_v35, %v2469_v26  ;;  %v2516_v37 = vmax.f32 %v2510_v33, 0.0 }
 0x2db   :  { %v2517_v39 = vmax.f32 %v2512_v36, 0.0  ;;  %v2518_v20 = vpack.c.bf16 %v2516_v37, %v2514_v27 }
 0x2dd   :  { %v2519_v40 = vpack.c.bf16 %v2517_v39, %v2515_v38 }
 0x2df   :  { %2687 = vmatprep.mubr.bf16.mxu0 %v2519_v40 }
 0x2e0   :  { %2688 = vmatmul.mubr.bf16.vlgmr.msra.gmra.mxu0 %v2518_v20 }
 0x3a0   :  { %v3070_v32 = vpop.f32.mrf.mxu0 }
 0x3a2   :  { %v3071_v42 = vpop.f32.mrf.mxu0 }
 0x3a3   :  { %v3072_v43 = vadd.f32 %v3071_v42, %v3070_v32 }
 0x3a4   :  { %v3073_v44 = vpop.f32.mrf.mxu0 }
 0x3a5   :  { %v2690_v46 = vadd.f32 %v3072_v43, %v3037_v41 }
 0x3a6   :  { %v3074_v48 = vpop.f32.mrf.mxu0 }
 0x3a7   :  { %2696 = vst [vmem:[#allocation11] sm:$0xff] %v2690_v46  ;;  %v3075_v12 = vadd.f32 %v3074_v48, %v3073_v44 }
 0x3a9   :  { %v2693_v28 = vadd.f32 %v3075_v12, %v3037_v41 }
 0x3ab   :  { %2697 = vst [vmem:[#allocation11 + $0x8] sm:$0xff] %v2693_v28 }
 0x3ac   :  { %3696 = shalt.err (!%p3693_p1)
}
 0x3ad   :  { %2709 = dma.vmem_to_hbm [thread:$0]  %s2704_s9, 256, %s3855_s7, [#allocation4], %s3717_s11, %s3717_s11, %s3718_s12  }
 0x3ae   :  { %3711 = dma.done.wait [#allocation4], 256  }
 0x3af   :  { %3712 = vsyncadd [#allocation4], 4294967040 }
 0x3b0   :  { %2713 = vsyncpa [#allocation3], 1 }
 0x3b1   :  { %2714 = vsyncpa [#allocation6], 1 }
 0x3b2   :  { %2715 = vsyncpa [#allocation9], 1 }
 0x3b3   :  { %2716 = vsyncpa [#allocation4], 1 }

</bundles_post_ra>
